<compile_context>
chip_gen: v7x
topology: tpu7x:2x2x1
jax: 0.10.0
libtpu: 0.0.40
codegen_flags: <defaults>
</compile_context>

<pallas_src>
import jax
import jax.numpy as jnp
from jax.experimental import pallas as pl
from jax.experimental.pallas import tpu as pltpu


def _round_up(x, m):
    return (x + m - 1) // m * m


# ---------------------------------------------------------------------------
# Prologue: max_norm=1 renorm of the embedding table (runs ONCE, not once per
# batch tile).  torch uses scale = 1/(norm + 1e-7) when norm > 1; rsqrt(sq)
# differs by <= 1e-7 relative in that regime (norm > 1), within tolerance.
# ---------------------------------------------------------------------------
def renorm_kernel(emb_ref, out_ref):
    emb = emb_ref[...]                                       # (trow, Dp)
    sq = jnp.sum(emb * emb, axis=1, keepdims=True)           # (trow, 1)
    scale = jnp.where(sq > 1.0, jax.lax.rsqrt(sq), 1.0)
    out_ref[...] = emb * scale


def renorm_embedding(emb_p):
    Vr, Dp = emb_p.shape
    trow = min(Vr, 2048)
    while Vr % trow != 0:            # Vr is a multiple of 128, so this halts
        trow -= 128
    return pl.pallas_call(
        renorm_kernel,
        out_shape=jax.ShapeDtypeStruct((Vr, Dp), jnp.float32),
        grid_spec=pltpu.PrefetchScalarGridSpec(
            num_scalar_prefetch=0,
            grid=(Vr // trow,),
            in_specs=[pl.BlockSpec((trow, Dp), lambda r: (r, 0))],
            out_specs=pl.BlockSpec((trow, Dp), lambda r: (r, 0)),
        ),
        compiler_params=pltpu.CompilerParams(
            dimension_semantics=("parallel",)),
    )(emb_p)


# ---------------------------------------------------------------------------
# Main fused kernel: bag-mean (cached per batch tile) + linear tile.
# ---------------------------------------------------------------------------
def cbow_kernel(x_ref, emb_ref, w_ref, b_ref, out_ref, mean_ref):
    # ---- Stage 1: bag means (invariant across the V_out grid axis) --------
    @pl.when(pl.program_id(1) == 0)
    def _bag_means():
        tb, s_len = x_ref.shape
        v_rows = emb_ref.shape[0]

        ids = x_ref[...]                                      # (tb, S) int32
        iota_v = jax.lax.broadcasted_iota(jnp.int32, (tb, v_rows), 1)

        # Per-bag token counts (padding_idx=0 excluded) as a pure value
        # accumulation — no scratch RMW, so no per-iteration tile store.
        counts = jnp.zeros((tb, v_rows), jnp.float32)
        nvalid = jnp.zeros((tb, 1), jnp.float32)
        for s in range(s_len):                  # S is small & static -> unrolled
            col = ids[:, s:s + 1]                             # (tb, 1)
            valid = col != 0
            counts = counts + jnp.where(
                jnp.logical_and(valid, iota_v == col), 1.0, 0.0)
            nvalid = nvalid + valid.astype(jnp.float32)

        # Bag sums via counts @ emb_r on the MXU, then exact masked mean.
        # TODO(synk): for large vocab, replace this one-hot matmul with a
        # gather-and-sum over the resident emb_r (O(tb*S*Dp) vs O(tb*Vr*Dp)).
        sums = jnp.dot(counts, emb_ref[...],
                       preferred_element_type=jnp.float32)    # (tb, Dp)
        mean_ref[...] = jnp.where(
            nvalid > 0.0, sums / jnp.maximum(nvalid, 1.0), 0.0)

    # ---- Stage 2: linear for this (B_tile, V_out_tile) ---------------------
    # Weight is pre-transposed in the wrapper to (Dp, tv): contraction dim on
    # the RHS sublanes, output vocab on lanes -> plain MXU dot, no vxpose.
    out_ref[...] = jnp.dot(mean_ref[...], w_ref[...],
                           preferred_element_type=jnp.float32) + b_ref[...]


def cbow_forward(x, emb_weight, lin_weight, lin_bias, *, tb=128, tv=1024):
    """x: (B, S) int32 ids; returns (B, V) float32 logits."""
    B, S = x.shape
    V, D = emb_weight.shape
    assert lin_weight.shape == (V, D) and lin_bias.shape == (V,)

    # Pad to TPU-friendly shapes (D lane-dense; tiles (8,128)-aligned).
    Dp = _round_up(D, 128)
    Vr = _round_up(V, 128)                 # contraction dim of counts @ emb_r
    tv = min(tv, _round_up(V, 128))
    Vo = _round_up(V, tv)

    tb = min(tb, _round_up(B, 8))
    Bp = _round_up(B, tb)
    # Keep >= 2 batch tiles when the batch permits so the "parallel" axis can
    # be split across the two TensorCores of a v7x chip.
    if Bp // tb < 2 and B > 8:
        tb = _round_up((B + 1) // 2, 8)
        Bp = _round_up(B, tb)

    x_p = jnp.pad(x.astype(jnp.int32), ((0, Bp - B), (0, 0)))      # pad id = 0
    emb_p = jnp.pad(emb_weight.astype(jnp.float32),
                    ((0, Vr - V), (0, Dp - D)))
    # One-time pre-transpose of the linear weight to (Dp, Vo).
    w_t = jnp.pad(lin_weight.astype(jnp.float32),
                  ((0, Vo - V), (0, Dp - D))).T                     # (Dp, Vo)
    b_p = jnp.pad(lin_bias.astype(jnp.float32), (0, Vo - V)).reshape(1, Vo)

    # One-time max_norm renorm (prologue kernel) — not repeated per batch tile.
    emb_r = renorm_embedding(emb_p)

    grid = (Bp // tb, Vo // tv)

    # VMEM budget for this config (double-buffered ins/outs + scratch +
    # intermediates), with headroom, capped below v7x's 64 MiB physical VMEM.
    est = (2 * tb * S * 4 + 2 * Vr * Dp * 4 + 2 * Dp * tv * 4
           + 2 * 8 * tv * 4 + 2 * tb * tv * 4
           + tb * Dp * 4 + tb * Vr * 4)
    vmem_limit = int(min(max(2 * est + (8 << 20), 24 << 20), 56 << 20))

    out = pl.pallas_call(
        cbow_kernel,
        out_shape=jax.ShapeDtypeStruct((Bp, Vo), jnp.float32),
        grid_spec=pltpu.PrefetchScalarGridSpec(
            num_scalar_prefetch=0,
            grid=grid,
            in_specs=[
                pl.BlockSpec((tb, S), lambda i, j: (i, 0)),    # token ids
                pl.BlockSpec((Vr, Dp), lambda i, j: (0, 0)),   # renormed table
                pl.BlockSpec((Dp, tv), lambda i, j: (0, j)),   # W^T tile
                pl.BlockSpec((1, tv), lambda i, j: (0, j)),    # bias tile
            ],
            out_specs=pl.BlockSpec((tb, tv), lambda i, j: (i, j)),
            scratch_shapes=[
                pltpu.VMEM((tb, Dp), jnp.float32),   # cached bag means
            ],
        ),
        compiler_params=pltpu.CompilerParams(
            dimension_semantics=("parallel", "arbitrary"),
            vmem_limit_bytes=vmem_limit,
        ),
    )(x_p, emb_r, w_t, b_p)

    return out[:B, :V]


def cbow_reference(x, emb_weight, lin_weight, lin_bias):
    """Pure-JAX reference matching torch semantics."""
    norms = jnp.linalg.norm(emb_weight, axis=1, keepdims=True)
    scale = jnp.where(norms > 1.0, 1.0 / (norms + 1e-7), 1.0)
    emb_r = emb_weight * scale
    gathered = emb_r[x]                                   # (B, S, D)
    valid = (x != 0).astype(jnp.float32)[..., None]       # (B, S, 1)
    sums = jnp.sum(gathered * valid, axis=1)              # (B, D)
    n = jnp.sum(valid, axis=1)                            # (B, 1)
    mean = jnp.where(n > 0.0, sums / jnp.maximum(n, 1.0), 0.0)
    return mean @ lin_weight.T + lin_bias


if __name__ == "__main__":
    VOCAB, EMB_DIM = 1024, 128
    B, S = 256, 8

    key = jax.random.PRNGKey(0)
    k_emb, k_w, k_b, k_x, k_m = jax.random.split(key, 5)

    # nn.EmbeddingBag init: N(0,1); padding_idx row zeroed.
    emb_weight = jax.random.normal(k_emb, (VOCAB, EMB_DIM), jnp.float32)
    emb_weight = emb_weight.at[0].set(0.0)

    # nn.Linear init: U(-1/sqrt(D), 1/sqrt(D)).
    bound = 1.0 / (EMB_DIM ** 0.5)
    lin_weight = jax.random.uniform(k_w, (VOCAB, EMB_DIM), jnp.float32,
                                    minval=-bound, maxval=bound)
    lin_bias = jax.random.uniform(k_b, (VOCAB,), jnp.float32,
                                  minval=-bound, maxval=bound)

    # Token ids; id 0 acts as padding; row 3 is a fully-empty bag.
    x = jax.random.randint(k_x, (B, S), 1, VOCAB, dtype=jnp.int32)
    x = jnp.where(jax.random.uniform(k_m, (B, S)) < 0.2, 0, x)
    x = x.at[3].set(0)

    out = cbow_forward(x, emb_weight, lin_weight, lin_bias)
    jax.block_until_ready(out)

    ref = cbow_reference(x, emb_weight, lin_weight, lin_bias)
    assert out.shape == (B, VOCAB) and out.dtype == jnp.float32
    max_err = float(jnp.max(jnp.abs(out - ref)))
    assert jnp.allclose(out, ref, rtol=2e-3, atol=2e-3), f"max_err={max_err}"
    print("KERNEL_OK")
</pallas_src>

<mosaic_0001>
module attributes {stable_mosaic.version = 11 : i64} {
  func.func @renorm_kernel(%arg0: i32, %arg1: memref<1024x128xf32, #tpu.memory_space<vmem>>, %arg2: memref<1024x128xf32, #tpu.memory_space<vmem>>) attributes {dimension_semantics = [#tpu.dimension_semantics<parallel>], iteration_bounds = array<i64: 1>, scalar_prefetch = 0 : i64, scratch_operands = 0 : i64, tpu.core_type = #tpu.core_type<tc>, window_params = [{transform_indices = @transform_0, window_bounds = array<i64: 1024, 128>}, {transform_indices = @transform_1, window_bounds = array<i64: 1024, 128>}]} {
    %c0 = arith.constant 0 : index
    %c0_0 = arith.constant 0 : index
    %0 = vector.load %arg1[%c0, %c0_0] : memref<1024x128xf32, #tpu.memory_space<vmem>>, vector<1024x128xf32>
    %1 = arith.mulf %0, %0 : vector<1024x128xf32>
    %cst = arith.constant dense<0.000000e+00> : vector<1024xf32>
    %2 = vector.multi_reduction <add>, %1, %cst [1] : vector<1024x128xf32> to vector<1024xf32>
    %3 = vector.shape_cast %2 : vector<1024xf32> to vector<1024x1xf32>
    %cst_1 = arith.constant 1.000000e+00 : f32
    %4 = vector.broadcast %cst_1 : f32 to vector<1024x1xf32>
    %5 = arith.cmpf ogt, %3, %4 : vector<1024x1xf32>
    %6 = math.rsqrt %3 : vector<1024x1xf32>
    %cst_2 = arith.constant 1.000000e+00 : f32
    %7 = vector.broadcast %cst_2 : f32 to vector<1024x1xf32>
    %8 = arith.select %5, %6, %7 : vector<1024x1xi1>, vector<1024x1xf32>
    %9 = vector.broadcast %8 : vector<1024x1xf32> to vector<1024x128xf32>
    %10 = arith.mulf %0, %9 : vector<1024x128xf32>
    %c0_3 = arith.constant 0 : index
    %c0_4 = arith.constant 0 : index
    %11 = vector.load %arg2[%c0_3, %c0_4] : memref<1024x128xf32, #tpu.memory_space<vmem>>, vector<1024x128xf32>
    tpu.vector_store %arg2[%c0_3, %c0_4], %10 {strides = array<i32>} : memref<1024x128xf32, #tpu.memory_space<vmem>>, vector<1024x128xf32>,
    return
  }
  func.func @transform_0(%arg0: i32) -> (i32, i32) {
    %c0_i32 = arith.constant 0 : i32
    %c0_i32_0 = arith.constant 0 : i32
    return %arg0, %c0_i32 : i32, i32
  }
  func.func @transform_1(%arg0: i32) -> (i32, i32) {
    %c0_i32 = arith.constant 0 : i32
    %c0_i32_0 = arith.constant 0 : i32
    return %arg0, %c0_i32 : i32, i32
  }
}

</mosaic_0001>

<bundles_post_ra>
// kernel: tpu_custom_call.1
= control target key start
LH: loop header
LB: loop body
LE: loop exit
PB: predicated region body
PF: predicated region fallthrough
CT: control target
= control target key end

     0   :  { %6 = vsyncpa [#allocation3], 0  ;;  %s1928_s0 = inlined_call_operand.hbm [shape: f32[1024,128], index: 0, kind: input, shape index: {}]   ;;  %s1929_s1 = inlined_call_operand.hbm [shape: f32[1024,128], index: 1, kind: output, shape index: {}]  }
   0x1   :  { %7 = vsyncpa [#allocation4], 0  ;;  %s1592_s6 = smov [#allocation2]   ;;  %s1544_s10 = scalar_lea.hbm %s1928_s0, 16384 }
   0x2   :  { %s13_s7 = sshll.u32 %s1592_s6, 4  ;;  %p1545_p0 = scmp.ne.s32.totalorder %s1928_s0, %s1544_s10  ;;  %s14_s7 = int_to_ptr.vmem [resolvable:$true] %s13_s7 }
   0x3   :  { %p1548_p1 = scmp.lt.u32.totalorder %s1544_s10, %s1928_s0 }
   0x5   :  { %p1550_p2 = pnand %p1548_p1, %p1545_p0 }
   0x7   :  { %1553 = shalt.err (!%p1550_p2)
}
   0x8   :  { %s1554_s15 = scalar_lea.vmem %s14_s7, 16384  ;;  %p1559_p4 = scmp.lt.s32.totalorder %s14_s7, %s14_s7 }
   0x9   :  { %p1555_p3 = scmp.ne.s32.totalorder %s14_s7, %s1554_s15  ;;  %p1560_p5 = scmp.lt.s32.totalorder %s1554_s15, %s1554_s15 }
   0xb   :  { %p1561_p6 = por %p1560_p5, %p1559_p4 }
   0xd   :  { %p1562_p7 = pnand %p1561_p6, %p1555_p3 }
   0xf   :  { %1565 = shalt.err (!%p1562_p7)
}
  0x10   :  { %s1593_s16 = smov 128   ;;  %s1594_s17 = smov 8  }
  0x11   :  { %19 = dma.hbm_to_vmem [thread:$0]  %s1928_s0, 16384, %s14_s7, [#allocation3], %s1593_s16, %s1593_s16, %s1594_s17  }
  0x12   :  { %1588 = dma.done.wait [#allocation3], 16384  }
  0x13   :  { %1589 = vsyncadd [#allocation3], 4294950912  ;;  %v1621_v0 = vld [vmem:[#allocation2 + $0x10] sm:$0xff]  ;;  %v1623_v1 = vld [vmem:[#allocation2] sm:$0xff]  ;;  %s1595_s0 = smov [#allocation5]  }
  0x14   :  { %v1625_v2 = vld [vmem:[#allocation2 + $0x18] sm:$0xff]  ;;  %v153_v3 = vmul.f32 %v1621_v0, %v1621_v0  ;;  %v151_v4 = vmul.f32 %v1623_v1, %v1623_v1  ;;  %v1631_v5 = vld [vmem:[#allocation2 + $0x8] sm:$0xff]  ;;  %v1639_v9 = vld [vmem:[#allocation2 + $0x20] sm:$0xff]  ;;  %s1180_s20 = sshll.u32 %s1595_s0, 4  ;;  %s1181_s20 = int_to_ptr.vmem [resolvable:$true] %s1180_s20 }
  0x15   :  { %v154_v6 = vmul.f32 %v1625_v2, %v1625_v2  ;;  %v152_v7 = vmul.f32 %v1631_v5, %v1631_v5  ;;  %v1637_v8 = vld [vmem:[#allocation2 + $0x28] sm:$0xff]  ;;  %v155_v11 = vmul.f32 %v1639_v9, %v1639_v9  ;;  %v1645_v12 = vld [vmem:[#allocation2 + $0x38] sm:$0xff]  ;;  %v1647_v13 = vld [vmem:[#allocation2 + $0x30] sm:$0xff]  ;;  %s1566_s21 = scalar_lea.vmem %s1181_s20, 16384  ;;  %p1571_p9 = scmp.lt.s32.totalorder %s1181_s20, %s1181_s20 }
  0x16   :  { %283 = vadd.xlane.f32.xlu1 %v153_v3  ;;  %279 = vadd.xlane.f32.xlu0 %v151_v4  ;;  %v156_v10 = vmul.f32 %v1637_v8, %v1637_v8  ;;  %v158_v14 = vmul.f32 %v1645_v12, %v1645_v12  ;;  %v157_v15 = vmul.f32 %v1647_v13, %v1647_v13  ;;  %v1653_v16 = vld [vmem:[#allocation2 + $0x48] sm:$0xff]  ;;  %v1655_v17 = vld [vmem:[#allocation2 + $0x40] sm:$0xff]  ;;  %v1661_v20 = vld [vmem:[#allocation2 + $0x58] sm:$0xff]  ;;  %p1567_p8 = scmp.ne.s32.totalorder %s1181_s20, %s1566_s21  ;;  %p1572_p10 = scmp.lt.s32.totalorder %s1566_s21, %s1566_s21 }
  0x17   :  { %v160_v18 = vmul.f32 %v1653_v16, %v1653_v16  ;;  %v159_v19 = vmul.f32 %v1655_v17, %v1655_v17  ;;  %v1663_v21 = vld [vmem:[#allocation2 + $0x50] sm:$0xff]  ;;  %v162_v22 = vmul.f32 %v1661_v20, %v1661_v20  ;;  %v1669_v24 = vld [vmem:[#allocation2 + $0x68] sm:$0xff]  ;;  %v1671_v25 = vld [vmem:[#allocation2 + $0x60] sm:$0xff] }
  0x18   :  { %v161_v23 = vmul.f32 %v1663_v21, %v1663_v21  ;;  %v164_v26 = vmul.f32 %v1669_v24, %v1669_v24  ;;  %v163_v27 = vmul.f32 %v1671_v25, %v1671_v25  ;;  %v1677_v28 = vld [vmem:[#allocation2 + $0x78] sm:$0xff]  ;;  %v1679_v29 = vld [vmem:[#allocation2 + $0x70] sm:$0xff]  ;;  %v1685_v32 = vld [vmem:[#allocation2 + $0x88] sm:$0xff]  ;;  %p1573_p11 = por %p1572_p10, %p1571_p9 }
  0x19   :  { %v166_v30 = vmul.f32 %v1677_v28, %v1677_v28  ;;  %v165_v31 = vmul.f32 %v1679_v29, %v1679_v29  ;;  %v1687_v33 = vld [vmem:[#allocation2 + $0x80] sm:$0xff]  ;;  %v168_v34 = vmul.f32 %v1685_v32, %v1685_v32  ;;  %v1693_v36 = vld [vmem:[#allocation2 + $0x98] sm:$0xff]  ;;  %v1695_v37 = vld [vmem:[#allocation2 + $0x90] sm:$0xff] }
  0x1a   :  { %285 = vadd.xlane.f32.xlu1 %v154_v6  ;;  %281 = vadd.xlane.f32.xlu0 %v152_v7  ;;  %v167_v35 = vmul.f32 %v1687_v33, %v1687_v33  ;;  %v170_v38 = vmul.f32 %v1693_v36, %v1693_v36  ;;  %v169_v39 = vmul.f32 %v1695_v37, %v1695_v37  ;;  %v1701_v40 = vld [vmem:[#allocation2 + $0xa8] sm:$0xff]  ;;  %v1703_v41 = vld [vmem:[#allocation2 + $0xa0] sm:$0xff]  ;;  %v1709_v44 = vld [vmem:[#allocation2 + $0xb8] sm:$0xff]  ;;  %p1574_p12 = pnand %p1573_p11, %p1567_p8 }
  0x1b   :  { %v172_v42 = vmul.f32 %v1701_v40, %v1701_v40  ;;  %v171_v43 = vmul.f32 %v1703_v41, %v1703_v41  ;;  %v1711_v45 = vld [vmem:[#allocation2 + $0xb0] sm:$0xff]  ;;  %v174_v46 = vmul.f32 %v1709_v44, %v1709_v44  ;;  %v1717_v48 = vld [vmem:[#allocation2 + $0xc8] sm:$0xff]  ;;  %v1719_v49 = vld [vmem:[#allocation2 + $0xc0] sm:$0xff] }
  0x1c   :  { %v173_v47 = vmul.f32 %v1711_v45, %v1711_v45  ;;  %v176_v50 = vmul.f32 %v1717_v48, %v1717_v48  ;;  %v175_v51 = vmul.f32 %v1719_v49, %v1719_v49  ;;  %v1725_v52 = vld [vmem:[#allocation2 + $0xd8] sm:$0xff]  ;;  %v1727_v53 = vld [vmem:[#allocation2 + $0xd0] sm:$0xff]  ;;  %v1733_v56 = vld [vmem:[#allocation2 + $0xe8] sm:$0xff] }
  0x1d   :  { %v178_v54 = vmul.f32 %v1725_v52, %v1725_v52  ;;  %v177_v55 = vmul.f32 %v1727_v53, %v1727_v53  ;;  %v1735_v57 = vld [vmem:[#allocation2 + $0xe0] sm:$0xff]  ;;  %v180_v58 = vmul.f32 %v1733_v56, %v1733_v56  ;;  %v1741_v60 = vld [vmem:[#allocation2 + $0xf8] sm:$0xff]  ;;  %v1743_v61 = vld [vmem:[#allocation2 + $0xf0] sm:$0xff] }
  0x1e   :  { %289 = vadd.xlane.f32.xlu1 %v156_v10  ;;  %287 = vadd.xlane.f32.xlu0 %v155_v11  ;;  %v179_v59 = vmul.f32 %v1735_v57, %v1735_v57  ;;  %v182_v62 = vmul.f32 %v1741_v60, %v1741_v60  ;;  %v181_v63 = vmul.f32 %v1743_v61, %v1743_v61  ;;  %v1749_v3 = vld [vmem:[#allocation2 + $0x108] sm:$0xff]  ;;  %v1751_v4 = vld [vmem:[#allocation2 + $0x100] sm:$0xff]  ;;  %v1757_v10 = vld [vmem:[#allocation2 + $0x118] sm:$0xff] }
  0x1f   :  { %v184_v6 = vmul.f32 %v1749_v3, %v1749_v3  ;;  %v183_v7 = vmul.f32 %v1751_v4, %v1751_v4  ;;  %v1759_v11 = vld [vmem:[#allocation2 + $0x110] sm:$0xff] }
  0x22   :  { %293 = vadd.xlane.f32.xlu1 %v158_v14  ;;  %291 = vadd.xlane.f32.xlu0 %v157_v15  ;;  %v186_v14 = vmul.f32 %v1757_v10, %v1757_v10  ;;  %v185_v15 = vmul.f32 %v1759_v11, %v1759_v11 }
  0x26   :  { %297 = vadd.xlane.f32.xlu1 %v160_v18  ;;  %295 = vadd.xlane.f32.xlu0 %v159_v19  ;;  %v60_v18 = vld [vmem:[#allocation2 + $0x128] sm:$0xff]  ;;  %v59_v19 = vld [vmem:[#allocation2 + $0x120] sm:$0xff] }
  0x2a   :  { %301 = vadd.xlane.f32.xlu1 %v162_v22  ;;  %299 = vadd.xlane.f32.xlu0 %v161_v23  ;;  %v188_v22 = vmul.f32 %v60_v18, %v60_v18  ;;  %v187_v23 = vmul.f32 %v59_v19, %v59_v19  ;;  %v74_v18 = vld [vmem:[#allocation2 + $0x198] sm:$0xff]  ;;  %v73_v19 = vld [vmem:[#allocation2 + $0x190] sm:$0xff] }
  0x2e   :  { %305 = vadd.xlane.f32.xlu1 %v164_v26  ;;  %303 = vadd.xlane.f32.xlu0 %v163_v27  ;;  %v62_v26 = vld [vmem:[#allocation2 + $0x138] sm:$0xff]  ;;  %v61_v27 = vld [vmem:[#allocation2 + $0x130] sm:$0xff] }
  0x32   :  { %309 = vadd.xlane.f32.xlu1 %v166_v30  ;;  %307 = vadd.xlane.f32.xlu0 %v165_v31  ;;  %v190_v30 = vmul.f32 %v62_v26, %v62_v26  ;;  %v189_v31 = vmul.f32 %v61_v27, %v61_v27  ;;  %v76_v26 = vld [vmem:[#allocation2 + $0x1a8] sm:$0xff]  ;;  %v75_v27 = vld [vmem:[#allocation2 + $0x1a0] sm:$0xff] }
  0x36   :  { %313 = vadd.xlane.f32.xlu1 %v168_v34  ;;  %311 = vadd.xlane.f32.xlu0 %v167_v35  ;;  %v64_v34 = vld [vmem:[#allocation2 + $0x148] sm:$0xff]  ;;  %v63_v35 = vld [vmem:[#allocation2 + $0x140] sm:$0xff] }
  0x3a   :  { %317 = vadd.xlane.f32.xlu1 %v170_v38  ;;  %315 = vadd.xlane.f32.xlu0 %v169_v39  ;;  %v192_v38 = vmul.f32 %v64_v34, %v64_v34  ;;  %v191_v39 = vmul.f32 %v63_v35, %v63_v35  ;;  %v78_v34 = vld [vmem:[#allocation2 + $0x1b8] sm:$0xff]  ;;  %v77_v35 = vld [vmem:[#allocation2 + $0x1b0] sm:$0xff] }
  0x3e   :  { %321 = vadd.xlane.f32.xlu1 %v172_v42  ;;  %319 = vadd.xlane.f32.xlu0 %v171_v43  ;;  %v66_v42 = vld [vmem:[#allocation2 + $0x158] sm:$0xff]  ;;  %v65_v43 = vld [vmem:[#allocation2 + $0x150] sm:$0xff] }
  0x42   :  { %325 = vadd.xlane.f32.xlu1 %v174_v46  ;;  %323 = vadd.xlane.f32.xlu0 %v173_v47  ;;  %v194_v46 = vmul.f32 %v66_v42, %v66_v42  ;;  %v193_v47 = vmul.f32 %v65_v43, %v65_v43  ;;  %v80_v42 = vld [vmem:[#allocation2 + $0x1c8] sm:$0xff]  ;;  %v79_v43 = vld [vmem:[#allocation2 + $0x1c0] sm:$0xff] }
  0x46   :  { %329 = vadd.xlane.f32.xlu1 %v176_v50  ;;  %327 = vadd.xlane.f32.xlu0 %v175_v51  ;;  %v68_v50 = vld [vmem:[#allocation2 + $0x168] sm:$0xff]  ;;  %v67_v51 = vld [vmem:[#allocation2 + $0x160] sm:$0xff] }
  0x4a   :  { %333 = vadd.xlane.f32.xlu1 %v178_v54  ;;  %331 = vadd.xlane.f32.xlu0 %v177_v55  ;;  %v196_v54 = vmul.f32 %v68_v50, %v68_v50  ;;  %v195_v55 = vmul.f32 %v67_v51, %v67_v51  ;;  %v82_v50 = vld [vmem:[#allocation2 + $0x1d8] sm:$0xff]  ;;  %v81_v51 = vld [vmem:[#allocation2 + $0x1d0] sm:$0xff] }
  0x4e   :  { %337 = vadd.xlane.f32.xlu1 %v180_v58  ;;  %335 = vadd.xlane.f32.xlu0 %v179_v59  ;;  %v70_v58 = vld [vmem:[#allocation2 + $0x178] sm:$0xff]  ;;  %v69_v59 = vld [vmem:[#allocation2 + $0x170] sm:$0xff] }
  0x52   :  { %341 = vadd.xlane.f32.xlu1 %v182_v62  ;;  %339 = vadd.xlane.f32.xlu0 %v181_v63  ;;  %v198_v62 = vmul.f32 %v70_v58, %v70_v58  ;;  %v197_v63 = vmul.f32 %v69_v59, %v69_v59  ;;  %v84_v58 = vld [vmem:[#allocation2 + $0x1e8] sm:$0xff]  ;;  %v83_v59 = vld [vmem:[#allocation2 + $0x1e0] sm:$0xff] }
  0x56   :  { %345 = vadd.xlane.f32.xlu1 %v184_v6  ;;  %343 = vadd.xlane.f32.xlu0 %v183_v7  ;;  %v72_v6 = vld [vmem:[#allocation2 + $0x188] sm:$0xff]  ;;  %v71_v7 = vld [vmem:[#allocation2 + $0x180] sm:$0xff] }
  0x5a   :  { %349 = vadd.xlane.f32.xlu1 %v186_v14  ;;  %347 = vadd.xlane.f32.xlu0 %v185_v15  ;;  %v200_v14 = vmul.f32 %v72_v6, %v72_v6  ;;  %v199_v15 = vmul.f32 %v71_v7, %v71_v7  ;;  %v86_v6 = vld [vmem:[#allocation2 + $0x1f8] sm:$0xff]  ;;  %v85_v7 = vld [vmem:[#allocation2 + $0x1f0] sm:$0xff] }
  0x5e   :  { %353 = vadd.xlane.f32.xlu1 %v188_v22  ;;  %351 = vadd.xlane.f32.xlu0 %v187_v23  ;;  %v202_v22 = vmul.f32 %v74_v18, %v74_v18  ;;  %v201_v23 = vmul.f32 %v73_v19, %v73_v19  ;;  %v88_v18 = vld [vmem:[#allocation2 + $0x208] sm:$0xff]  ;;  %v87_v19 = vld [vmem:[#allocation2 + $0x200] sm:$0xff] }
  0x62   :  { %357 = vadd.xlane.f32.xlu1 %v190_v30  ;;  %355 = vadd.xlane.f32.xlu0 %v189_v31  ;;  %v204_v30 = vmul.f32 %v76_v26, %v76_v26  ;;  %v203_v31 = vmul.f32 %v75_v27, %v75_v27  ;;  %v90_v26 = vld [vmem:[#allocation2 + $0x218] sm:$0xff]  ;;  %v89_v27 = vld [vmem:[#allocation2 + $0x210] sm:$0xff] }
  0x66   :  { %361 = vadd.xlane.f32.xlu1 %v192_v38  ;;  %359 = vadd.xlane.f32.xlu0 %v191_v39  ;;  %v206_v38 = vmul.f32 %v78_v34, %v78_v34  ;;  %v205_v39 = vmul.f32 %v77_v35, %v77_v35  ;;  %v92_v34 = vld [vmem:[#allocation2 + $0x228] sm:$0xff]  ;;  %v91_v35 = vld [vmem:[#allocation2 + $0x220] sm:$0xff] }
  0x6a   :  { %365 = vadd.xlane.f32.xlu1 %v194_v46  ;;  %363 = vadd.xlane.f32.xlu0 %v193_v47  ;;  %v208_v46 = vmul.f32 %v80_v42, %v80_v42  ;;  %v207_v47 = vmul.f32 %v79_v43, %v79_v43  ;;  %v94_v42 = vld [vmem:[#allocation2 + $0x238] sm:$0xff]  ;;  %v93_v43 = vld [vmem:[#allocation2 + $0x230] sm:$0xff] }
  0x6e   :  { %369 = vadd.xlane.f32.xlu1 %v196_v54  ;;  %367 = vadd.xlane.f32.xlu0 %v195_v55  ;;  %v210_v54 = vmul.f32 %v82_v50, %v82_v50  ;;  %v209_v55 = vmul.f32 %v81_v51, %v81_v51  ;;  %v96_v50 = vld [vmem:[#allocation2 + $0x248] sm:$0xff]  ;;  %v95_v51 = vld [vmem:[#allocation2 + $0x240] sm:$0xff] }
  0x72   :  { %373 = vadd.xlane.f32.xlu1 %v198_v62  ;;  %371 = vadd.xlane.f32.xlu0 %v197_v63  ;;  %v212_v62 = vmul.f32 %v84_v58, %v84_v58  ;;  %v211_v63 = vmul.f32 %v83_v59, %v83_v59 }
  0x76   :  { %377 = vadd.xlane.f32.xlu1 %v200_v14  ;;  %375 = vadd.xlane.f32.xlu0 %v199_v15  ;;  %v214_v14 = vmul.f32 %v86_v6, %v86_v6  ;;  %v213_v15 = vmul.f32 %v85_v7, %v85_v7 }
  0x7a   :  { %381 = vadd.xlane.f32.xlu1 %v202_v22  ;;  %379 = vadd.xlane.f32.xlu0 %v201_v23  ;;  %v216_v22 = vmul.f32 %v88_v18, %v88_v18  ;;  %v215_v23 = vmul.f32 %v87_v19, %v87_v19  ;;  %v100_v18 = vld [vmem:[#allocation2 + $0x268] sm:$0xff]  ;;  %v99_v19 = vld [vmem:[#allocation2 + $0x260] sm:$0xff] }
  0x7e   :  { %385 = vadd.xlane.f32.xlu1 %v204_v30  ;;  %383 = vadd.xlane.f32.xlu0 %v203_v31  ;;  %v218_v30 = vmul.f32 %v90_v26, %v90_v26  ;;  %v217_v31 = vmul.f32 %v89_v27, %v89_v27 }
  0x82   :  { %389 = vadd.xlane.f32.xlu1 %v206_v38  ;;  %387 = vadd.xlane.f32.xlu0 %v205_v39  ;;  %v220_v38 = vmul.f32 %v92_v34, %v92_v34  ;;  %v219_v39 = vmul.f32 %v91_v35, %v91_v35 }
  0x86   :  { %393 = vadd.xlane.f32.xlu1 %v208_v46  ;;  %391 = vadd.xlane.f32.xlu0 %v207_v47  ;;  %v222_v46 = vmul.f32 %v94_v42, %v94_v42  ;;  %v221_v47 = vmul.f32 %v93_v43, %v93_v43 }
  0x8a   :  { %397 = vadd.xlane.f32.xlu1 %v210_v54  ;;  %395 = vadd.xlane.f32.xlu0 %v209_v55  ;;  %v224_v54 = vmul.f32 %v96_v50, %v96_v50  ;;  %v223_v55 = vmul.f32 %v95_v51, %v95_v51  ;;  %v103_v50 = vld [vmem:[#allocation2 + $0x280] sm:$0xff] }
  0x8e   :  { %401 = vadd.xlane.f32.xlu1 %v212_v62  ;;  %399 = vadd.xlane.f32.xlu0 %v211_v63  ;;  %v98_v62 = vld [vmem:[#allocation2 + $0x258] sm:$0xff]  ;;  %v97_v63 = vld [vmem:[#allocation2 + $0x250] sm:$0xff] }
  0x8f   :  { %v226_v6 = vmul.f32 %v98_v62, %v98_v62  ;;  %v225_v7 = vmul.f32 %v97_v63, %v97_v63 }
  0x92   :  { %405 = vadd.xlane.f32.xlu1 %v214_v14  ;;  %403 = vadd.xlane.f32.xlu0 %v213_v15 }
  0x96   :  { %409 = vadd.xlane.f32.xlu1 %v216_v22  ;;  %407 = vadd.xlane.f32.xlu0 %v215_v23  ;;  %v228_v22 = vmul.f32 %v100_v18, %v100_v18  ;;  %v227_v23 = vmul.f32 %v99_v19, %v99_v19  ;;  %v105_v19 = vld [vmem:[#allocation2 + $0x290] sm:$0xff] }
  0x9a   :  { %413 = vadd.xlane.f32.xlu1 %v218_v30  ;;  %411 = vadd.xlane.f32.xlu0 %v217_v31  ;;  %v102_v30 = vld [vmem:[#allocation2 + $0x278] sm:$0xff]  ;;  %v101_v31 = vld [vmem:[#allocation2 + $0x270] sm:$0xff] }
  0x9b   :  { %v230_v35 = vmul.f32 %v102_v30, %v102_v30 }
  0x9e   :  { %417 = vadd.xlane.f32.xlu1 %v220_v38  ;;  %415 = vadd.xlane.f32.xlu0 %v219_v39  ;;  %v229_v38 = vmul.f32 %v101_v31, %v101_v31 }
  0xa2   :  { %421 = vadd.xlane.f32.xlu1 %v222_v46  ;;  %419 = vadd.xlane.f32.xlu0 %v221_v47  ;;  %v104_v47 = vld [vmem:[#allocation2 + $0x288] sm:$0xff] }
  0xa3   :  { %v284_v58 = vpop.xlane.xlu1 %283  ;;  %v280_v59 = vpop.xlane.xlu0 %279  ;;  %v232_v62 = vmul.f32 %v104_v47, %v104_v47 }
  0xa4   :  { %1196 = vrsqrt.f32 %v284_v58  ;;  %vm537_vm0 = vcmp.gt.f32.partialorder %v284_v58, 1.0  ;;  %vm535_vm1 = vcmp.gt.f32.partialorder %v280_v59, 1.0 }
  0xa5   :  { %1198 = vrsqrt.f32 %v280_v59  ;;  %v231_v59 = vmul.f32 %v103_v50, %v103_v50 }
  0xa6   :  { %425 = vadd.xlane.f32.xlu1 %v224_v54  ;;  %423 = vadd.xlane.f32.xlu0 %v223_v55 }
  0xa7   :  { %v286_v14 = vpop.xlane.xlu1 %285  ;;  %v282_v15 = vpop.xlane.xlu0 %281 }
  0xa8   :  { %1200 = vrsqrt.f32 %v286_v14  ;;  %vm538_vm2 = vcmp.gt.f32.partialorder %v286_v14, 1.0  ;;  %vm536_vm3 = vcmp.gt.f32.partialorder %v282_v15, 1.0 }
  0xa9   :  { %1202 = vrsqrt.f32 %v282_v15  ;;  %v233_v15 = vmul.f32 %v105_v19, %v105_v19 }
  0xaa   :  { %429 = vadd.xlane.f32.xlu1 %v226_v6  ;;  %427 = vadd.xlane.f32.xlu0 %v225_v7 }
  0xab   :  { %v290_v26 = vpop.xlane.xlu1 %289  ;;  %v288_v27 = vpop.xlane.xlu0 %287 }
  0xac   :  { %1204 = vrsqrt.f32 %v290_v26  ;;  %vm540_vm4 = vcmp.gt.f32.partialorder %v290_v26, 1.0  ;;  %vm539_vm5 = vcmp.gt.f32.partialorder %v288_v27, 1.0 }
  0xad   :  { %1206 = vrsqrt.f32 %v288_v27 }
  0xae   :  { %v1197_v34 = vpop.eup %1196  ;;  %433 = vadd.xlane.f32.xlu1 %v228_v22  ;;  %431 = vadd.xlane.f32.xlu0 %v227_v23 }
  0xaf   :  { %v1199_v39 = vpop.eup %1198  ;;  %v793_v42 = vsel %vm537_vm0, %v1197_v34, 1.0  ;;  %v294_v43 = vpop.xlane.xlu1 %293 }
  0xb0   :  { %v1765_v46 = vpop.xlane.xlu0 %291  ;;  %v921_v51 = vmul.f32 %v793_v42, %v1621_v0  ;;  %v791_v54 = vsel %vm535_vm1, %v1199_v39, 1.0  ;;  %1208 = vrsqrt.f32 %v294_v43  ;;  %v106_v0 = vld [vmem:[#allocation2 + $0x298] sm:$0xff]  ;;  %v107_v39 = vld [vmem:[#allocation2 + $0x2a0] sm:$0xff]  ;;  %vm542_vm6 = vcmp.gt.f32.partialorder %v294_v43, 1.0 }
  0xb1   :  { %v919_v55 = vmul.f32 %v791_v54, %v1623_v1  ;;  %1210 = vrsqrt.f32 %v1765_v46  ;;  %v234_v30 = vmul.f32 %v106_v0, %v106_v0  ;;  %v235_v27 = vmul.f32 %v107_v39, %v107_v39  ;;  %v114_v39 = vld [vmem:[#allocation2 + $0x2d8] sm:$0xff] }
  0xb2   :  { %v1201_v58 = vpop.eup %1200  ;;  %1049 = vst [vmem:[#allocation5 + $0x10] sm:$0xff] %v921_v51  ;;  %437 = vadd.xlane.f32.xlu1 %v230_v35  ;;  %435 = vadd.xlane.f32.xlu0 %v229_v38  ;;  %vm541_vm7 = vcmp.gt.f32.partialorder %v1765_v46, 1.0 }
  0xb3   :  { %v1203_v63 = vpop.eup %1202  ;;  %1047 = vst [vmem:[#allocation5] sm:$0xff] %v919_v55  ;;  %v794_v6 = vsel %vm538_vm2, %v1201_v58, 1.0  ;;  %v298_v7 = vpop.xlane.xlu1 %297  ;;  %v110_v58 = vld [vmem:[#allocation2 + $0x2b8] sm:$0xff] }
  0xb4   :  { %v1770_v18 = vpop.xlane.xlu0 %295  ;;  %v922_v1 = vmul.f32 %v794_v6, %v1625_v2  ;;  %v792_v22 = vsel %vm536_vm3, %v1203_v63, 1.0  ;;  %1212 = vrsqrt.f32 %v298_v7  ;;  %v108_v2 = vld [vmem:[#allocation2 + $0x2a8] sm:$0xff]  ;;  %vm544_vm8 = vcmp.gt.f32.partialorder %v298_v7, 1.0 }
  0xb5   :  { %v920_v23 = vmul.f32 %v792_v22, %v1631_v5  ;;  %1214 = vrsqrt.f32 %v1770_v18  ;;  %v236_v50 = vmul.f32 %v108_v2, %v108_v2  ;;  %v238_v6 = vmul.f32 %v110_v58, %v110_v58  ;;  %v112_v22 = vld [vmem:[#allocation2 + $0x2c8] sm:$0xff]  ;;  %v115_v58 = vld [vmem:[#allocation2 + $0x2e0] sm:$0xff] }
  0xb6   :  { %v1205_v14 = vpop.eup %1204  ;;  %1050 = vst [vmem:[#allocation5 + $0x18] sm:$0xff] %v922_v1  ;;  %441 = vadd.xlane.f32.xlu1 %v232_v62  ;;  %439 = vadd.xlane.f32.xlu0 %v231_v59  ;;  %v109_v62 = vld [vmem:[#allocation2 + $0x2b0] sm:$0xff]  ;;  %vm543_vm9 = vcmp.gt.f32.partialorder %v1770_v18, 1.0 }
  0xb7   :  { %v1207_v31 = vpop.eup %1206  ;;  %1048 = vst [vmem:[#allocation5 + $0x8] sm:$0xff] %v920_v23  ;;  %v796_v34 = vsel %vm540_vm4, %v1205_v14, 1.0  ;;  %v302_v35 = vpop.xlane.xlu1 %301  ;;  %v237_v46 = vmul.f32 %v109_v62, %v109_v62  ;;  %v111_v23 = vld [vmem:[#allocation2 + $0x2c0] sm:$0xff] }
  0xb8   :  { %v1775_v38 = vpop.xlane.xlu0 %299  ;;  %v924_v5 = vmul.f32 %v796_v34, %v1637_v8  ;;  %v795_v42 = vsel %vm539_vm5, %v1207_v31, 1.0  ;;  %1216 = vrsqrt.f32 %v302_v35  ;;  %vm546_vm10 = vcmp.gt.f32.partialorder %v302_v35, 1.0 }
  0xb9   :  { %v923_v47 = vmul.f32 %v795_v42, %v1639_v9  ;;  %1218 = vrsqrt.f32 %v1775_v38  ;;  %v239_v18 = vmul.f32 %v111_v23, %v111_v23  ;;  %vm545_vm11 = vcmp.gt.f32.partialorder %v1775_v38, 1.0 }
  0xba   :  { %v1209_v26 = vpop.eup %1208  ;;  %1052 = vst [vmem:[#allocation5 + $0x28] sm:$0xff] %v924_v5  ;;  %445 = vadd.xlane.f32.xlu1 %v234_v30  ;;  %443 = vadd.xlane.f32.xlu0 %v233_v15  ;;  %v240_v15 = vmul.f32 %v112_v22, %v112_v22  ;;  %v113_v5 = vld [vmem:[#allocation2 + $0x2d0] sm:$0xff] }
  0xbb   :  { %v1211_v51 = vpop.eup %1210  ;;  %1051 = vst [vmem:[#allocation5 + $0x20] sm:$0xff] %v923_v47  ;;  %v798_v54 = vsel %vm542_vm6, %v1209_v26, 1.0  ;;  %v306_v55 = vpop.xlane.xlu1 %305  ;;  %v242_v26 = vmul.f32 %v114_v39, %v114_v39  ;;  %v241_v38 = vmul.f32 %v113_v5, %v113_v5 }
  0xbc   :  { %v1781_v8 = vpop.xlane.xlu0 %303  ;;  %v926_v9 = vmul.f32 %v798_v54, %v1645_v12  ;;  %v797_v59 = vsel %vm541_vm7, %v1211_v51, 1.0  ;;  %1220 = vrsqrt.f32 %v306_v55  ;;  %vm548_vm12 = vcmp.gt.f32.partialorder %v306_v55, 1.0  ;;  %v116_v54 = vld [vmem:[#allocation2 + $0x2e8] sm:$0xff] }
  0xbd   :  { %v925_v43 = vmul.f32 %v797_v59, %v1647_v13  ;;  %1222 = vrsqrt.f32 %v1781_v8  ;;  %vm547_vm13 = vcmp.gt.f32.partialorder %v1781_v8, 1.0  ;;  %v244_v59 = vmul.f32 %v116_v54, %v116_v54 }
  0xbe   :  { %v1213_v63 = vpop.eup %1212  ;;  %1054 = vst [vmem:[#allocation5 + $0x38] sm:$0xff] %v926_v9  ;;  %449 = vadd.xlane.f32.xlu1 %v236_v50  ;;  %447 = vadd.xlane.f32.xlu0 %v235_v27  ;;  %v243_v8 = vmul.f32 %v115_v58, %v115_v58  ;;  %v124_v58 = vld [vmem:[#allocation2 + $0x328] sm:$0xff] }
  0xbf   :  { %v1215_v0 = vpop.eup %1214  ;;  %1053 = vst [vmem:[#allocation5 + $0x30] sm:$0xff] %v925_v43  ;;  %v800_v19 = vsel %vm544_vm8, %v1213_v63, 1.0  ;;  %v310_v1 = vpop.xlane.xlu1 %309 }
  0xc0   :  { %v1787_v12 = vpop.xlane.xlu0 %307  ;;  %v928_v13 = vmul.f32 %v800_v19, %v1653_v16  ;;  %v799_v14 = vsel %vm543_vm9, %v1215_v0, 1.0  ;;  %1224 = vrsqrt.f32 %v310_v1  ;;  %vm550_vm14 = vcmp.gt.f32.partialorder %v310_v1, 1.0  ;;  %v117_v0 = vld [vmem:[#allocation2 + $0x2f0] sm:$0xff] }
  0xc1   :  { %v927_v7 = vmul.f32 %v799_v14, %v1655_v17  ;;  %1226 = vrsqrt.f32 %v1787_v12  ;;  %vm549_vm15 = vcmp.gt.f32.partialorder %v1787_v12, 1.0  ;;  %v245_v12 = vmul.f32 %v117_v0, %v117_v0 }
  0xc2   :  { %v1217_v30 = vpop.eup %1216  ;;  %1056 = vst [vmem:[#allocation5 + $0x48] sm:$0xff] %v928_v13  ;;  %453 = vadd.xlane.f32.xlu1 %v238_v6  ;;  %451 = vadd.xlane.f32.xlu0 %v237_v46  ;;  %v118_v46 = vld [vmem:[#allocation2 + $0x2f8] sm:$0xff] }
  0xc3   :  { %v1219_v31 = vpop.eup %1218  ;;  %1055 = vst [vmem:[#allocation5 + $0x40] sm:$0xff] %v927_v7  ;;  %v802_v34 = vsel %vm546_vm10, %v1217_v30, 1.0  ;;  %v314_v2 = vpop.xlane.xlu1 %313  ;;  %v246_v23 = vmul.f32 %v118_v46, %v118_v46  ;;  %v120_v30 = vld [vmem:[#allocation2 + $0x308] sm:$0xff]  ;;  %v125_v46 = vld [vmem:[#allocation2 + $0x330] sm:$0xff] }
  0xc4   :  { %v1793_v16 = vpop.xlane.xlu0 %311  ;;  %v930_v17 = vmul.f32 %v802_v34, %v1661_v20  ;;  %v801_v42 = vsel %vm545_vm11, %v1219_v31, 1.0  ;;  %1228 = vrsqrt.f32 %v314_v2  ;;  %vm552_vm0 = vcmp.gt.f32.partialorder %v314_v2, 1.0 }
  0xc5   :  { %v929_v35 = vmul.f32 %v801_v42, %v1663_v21  ;;  %1230 = vrsqrt.f32 %v1793_v16  ;;  %vm551_vm1 = vcmp.gt.f32.partialorder %v1793_v16, 1.0  ;;  %v248_v2 = vmul.f32 %v120_v30, %v120_v30  ;;  %v122_v42 = vld [vmem:[#allocation2 + $0x318] sm:$0xff] }
  0xc6   :  { %v1221_v47 = vpop.eup %1220  ;;  %1058 = vst [vmem:[#allocation5 + $0x58] sm:$0xff] %v930_v17  ;;  %457 = vadd.xlane.f32.xlu1 %v240_v15  ;;  %455 = vadd.xlane.f32.xlu0 %v239_v18  ;;  %v119_v15 = vld [vmem:[#allocation2 + $0x300] sm:$0xff] }
  0xc7   :  { %v1223_v50 = vpop.eup %1222  ;;  %1057 = vst [vmem:[#allocation5 + $0x50] sm:$0xff] %v929_v35  ;;  %v804_v27 = vsel %vm548_vm12, %v1221_v47, 1.0  ;;  %v318_v51 = vpop.xlane.xlu1 %317  ;;  %v247_v16 = vmul.f32 %v119_v15, %v119_v15  ;;  %v121_v35 = vld [vmem:[#allocation2 + $0x310] sm:$0xff] }
  0xc8   :  { %v1799_v20 = vpop.xlane.xlu0 %315  ;;  %v932_v21 = vmul.f32 %v804_v27, %v1669_v24  ;;  %v803_v62 = vsel %vm547_vm13, %v1223_v50, 1.0  ;;  %1232 = vrsqrt.f32 %v318_v51  ;;  %vm554_vm2 = vcmp.gt.f32.partialorder %v318_v51, 1.0 }
  0xc9   :  { %v931_v55 = vmul.f32 %v803_v62, %v1671_v25  ;;  %1234 = vrsqrt.f32 %v1799_v20  ;;  %vm553_vm3 = vcmp.gt.f32.partialorder %v1799_v20, 1.0  ;;  %v250_v50 = vmul.f32 %v122_v42, %v122_v42 }
  0xca   :  { %v1225_v9 = vpop.eup %1224  ;;  %1060 = vst [vmem:[#allocation5 + $0x68] sm:$0xff] %v932_v21  ;;  %461 = vadd.xlane.f32.xlu1 %v242_v26  ;;  %459 = vadd.xlane.f32.xlu0 %v241_v38  ;;  %v249_v27 = vmul.f32 %v121_v35, %v121_v35  ;;  %v123_v21 = vld [vmem:[#allocation2 + $0x320] sm:$0xff] }
  0xcb   :  { %v1227_v43 = vpop.eup %1226  ;;  %1059 = vst [vmem:[#allocation5 + $0x60] sm:$0xff] %v931_v55  ;;  %v806_v63 = vsel %vm550_vm14, %v1225_v9, 1.0  ;;  %v322_v6 = vpop.xlane.xlu1 %321 }
  0xcc   :  { %v1805_v24 = vpop.xlane.xlu0 %319  ;;  %v934_v25 = vmul.f32 %v806_v63, %v1677_v28  ;;  %v805_v19 = vsel %vm549_vm15, %v1227_v43, 1.0  ;;  %1236 = vrsqrt.f32 %v322_v6  ;;  %vm556_vm4 = vcmp.gt.f32.partialorder %v322_v6, 1.0 }
  0xcd   :  { %v933_v1 = vmul.f32 %v805_v19, %v1679_v29  ;;  %1238 = vrsqrt.f32 %v1805_v24  ;;  %vm555_vm5 = vcmp.gt.f32.partialorder %v1805_v24, 1.0  ;;  %v126_v24 = vld [vmem:[#allocation2 + $0x338] sm:$0xff] }
  0xce   :  { %v1229_v22 = vpop.eup %1228  ;;  %1062 = vst [vmem:[#allocation5 + $0x78] sm:$0xff] %v934_v25  ;;  %465 = vadd.xlane.f32.xlu1 %v244_v59  ;;  %463 = vadd.xlane.f32.xlu0 %v243_v8  ;;  %v252_v59 = vmul.f32 %v124_v58, %v124_v58  ;;  %v251_v8 = vmul.f32 %v123_v21, %v123_v21 }
  0xcf   :  { %v1231_v13 = vpop.eup %1230  ;;  %1061 = vst [vmem:[#allocation5 + $0x70] sm:$0xff] %v933_v1  ;;  %v808_v14 = vsel %vm552_vm0, %v1229_v22, 1.0  ;;  %v326_v7 = vpop.xlane.xlu1 %325  ;;  %v254_v1 = vmul.f32 %v126_v24, %v126_v24  ;;  %v253_v22 = vmul.f32 %v125_v46, %v125_v46  ;;  %v136_v46 = vld [vmem:[#allocation2 + $0x388] sm:$0xff] }
  0xd0   :  { %v1811_v28 = vpop.xlane.xlu0 %323  ;;  %v936_v29 = vmul.f32 %v808_v14, %v1685_v32  ;;  %v807_v18 = vsel %vm551_vm1, %v1231_v13, 1.0  ;;  %1240 = vrsqrt.f32 %v326_v7  ;;  %vm558_vm6 = vcmp.gt.f32.partialorder %v326_v7, 1.0  ;;  %v128_v14 = vld [vmem:[#allocation2 + $0x348] sm:$0xff]  ;;  %v127_v7 = vld [vmem:[#allocation2 + $0x340] sm:$0xff] }
  0xd1   :  { %v935_v31 = vmul.f32 %v807_v18, %v1687_v33  ;;  %1242 = vrsqrt.f32 %v1811_v28  ;;  %vm557_vm7 = vcmp.gt.f32.partialorder %v1811_v28, 1.0  ;;  %v255_v18 = vmul.f32 %v127_v7, %v127_v7 }
  0xd2   :  { %v1233_v34 = vpop.eup %1232  ;;  %1064 = vst [vmem:[#allocation5 + $0x88] sm:$0xff] %v936_v29  ;;  %469 = vadd.xlane.f32.xlu1 %v246_v23  ;;  %467 = vadd.xlane.f32.xlu0 %v245_v12  ;;  %v256_v29 = vmul.f32 %v128_v14, %v128_v14 }
  0xd3   :  { %v1235_v39 = vpop.eup %1234  ;;  %1063 = vst [vmem:[#allocation5 + $0x80] sm:$0xff] %v935_v31  ;;  %v810_v5 = vsel %vm554_vm2, %v1233_v34, 1.0  ;;  %v330_v17 = vpop.xlane.xlu1 %329 }
  0xd4   :  { %v1817_v32 = vpop.xlane.xlu0 %327  ;;  %v938_v33 = vmul.f32 %v810_v5, %v1693_v36  ;;  %v809_v47 = vsel %vm553_vm3, %v1235_v39, 1.0  ;;  %1244 = vrsqrt.f32 %v330_v17  ;;  %vm560_vm8 = vcmp.gt.f32.partialorder %v330_v17, 1.0  ;;  %v129_v39 = vld [vmem:[#allocation2 + $0x350] sm:$0xff] }
  0xd5   :  { %v937_v26 = vmul.f32 %v809_v47, %v1695_v37  ;;  %1246 = vrsqrt.f32 %v1817_v32  ;;  %vm559_vm9 = vcmp.gt.f32.partialorder %v1817_v32, 1.0  ;;  %v257_v35 = vmul.f32 %v129_v39, %v129_v39  ;;  %v1453_v39 = vld [vmem:[#allocation2 + $0x120] sm:$0xff] }
  0xd6   :  { %v1237_v38 = vpop.eup %1236  ;;  %1066 = vst [vmem:[#allocation5 + $0x98] sm:$0xff] %v938_v33  ;;  %473 = vadd.xlane.f32.xlu1 %v248_v2  ;;  %471 = vadd.xlane.f32.xlu0 %v247_v16  ;;  %v130_v16 = vld [vmem:[#allocation2 + $0x358] sm:$0xff] }
  0xd7   :  { %v1239_v51 = vpop.eup %1238  ;;  %1065 = vst [vmem:[#allocation5 + $0x90] sm:$0xff] %v937_v26  ;;  %v812_v20 = vsel %vm556_vm4, %v1237_v38, 1.0  ;;  %v334_v54 = vpop.xlane.xlu1 %333  ;;  %v258_v42 = vmul.f32 %v130_v16, %v130_v16  ;;  %v132_v38 = vld [vmem:[#allocation2 + $0x368] sm:$0xff] }
  0xd8   :  { %v1823_v36 = vpop.xlane.xlu0 %331  ;;  %v940_v37 = vmul.f32 %v812_v20, %v1701_v40  ;;  %v811_v62 = vsel %vm555_vm5, %v1239_v51, 1.0  ;;  %1248 = vrsqrt.f32 %v334_v54  ;;  %vm562_vm10 = vcmp.gt.f32.partialorder %v334_v54, 1.0 }
  0xd9   :  { %v939_v55 = vmul.f32 %v811_v62, %v1703_v41  ;;  %1250 = vrsqrt.f32 %v1823_v36  ;;  %vm561_vm11 = vcmp.gt.f32.partialorder %v1823_v36, 1.0  ;;  %v260_v54 = vmul.f32 %v132_v38, %v132_v38  ;;  %v134_v62 = vld [vmem:[#allocation2 + $0x378] sm:$0xff] }
  0xda   :  { %v1241_v9 = vpop.eup %1240  ;;  %1068 = vst [vmem:[#allocation5 + $0xa8] sm:$0xff] %v940_v37  ;;  %477 = vadd.xlane.f32.xlu1 %v250_v50  ;;  %475 = vadd.xlane.f32.xlu0 %v249_v27  ;;  %v131_v50 = vld [vmem:[#allocation2 + $0x360] sm:$0xff]  ;;  %v1454_v38 = vld [vmem:[#allocation2 + $0x138] sm:$0xff] }
  0xdb   :  { %v1243_v43 = vpop.eup %1242  ;;  %1067 = vst [vmem:[#allocation5 + $0xa0] sm:$0xff] %v939_v55  ;;  %v814_v63 = vsel %vm558_vm6, %v1241_v9, 1.0  ;;  %v338_v6 = vpop.xlane.xlu1 %337  ;;  %v259_v36 = vmul.f32 %v131_v50, %v131_v50  ;;  %v133_v55 = vld [vmem:[#allocation2 + $0x370] sm:$0xff] }
  0xdc   :  { %v1829_v40 = vpop.xlane.xlu0 %335  ;;  %v942_v41 = vmul.f32 %v814_v63, %v1709_v44  ;;  %v813_v0 = vsel %vm557_vm7, %v1243_v43, 1.0  ;;  %1252 = vrsqrt.f32 %v338_v6  ;;  %vm564_vm12 = vcmp.gt.f32.partialorder %v338_v6, 1.0 }
  0xdd   :  { %v941_v25 = vmul.f32 %v813_v0, %v1711_v45  ;;  %1254 = vrsqrt.f32 %v1829_v40  ;;  %vm563_vm13 = vcmp.gt.f32.partialorder %v1829_v40, 1.0  ;;  %v262_v43 = vmul.f32 %v134_v62, %v134_v62  ;;  %v144_v62 = vld [vmem:[#allocation2 + $0x3c8] sm:$0xff] }
  0xde   :  { %v1245_v19 = vpop.eup %1244  ;;  %1070 = vst [vmem:[#allocation5 + $0xb8] sm:$0xff] %v942_v41  ;;  %481 = vadd.xlane.f32.xlu1 %v252_v59  ;;  %479 = vadd.xlane.f32.xlu0 %v251_v8  ;;  %v261_v63 = vmul.f32 %v133_v55, %v133_v55  ;;  %v135_v41 = vld [vmem:[#allocation2 + $0x380] sm:$0xff] }
  0xdf   :  { %v1247_v23 = vpop.eup %1246  ;;  %1069 = vst [vmem:[#allocation5 + $0xb0] sm:$0xff] %v941_v25  ;;  %v816_v12 = vsel %vm560_vm8, %v1245_v19, 1.0  ;;  %v342_v13 = vpop.xlane.xlu1 %341  ;;  %v143_v55 = vld [vmem:[#allocation2 + $0x3c0] sm:$0xff] }
  0xe0   :  { %v1835_v44 = vpop.xlane.xlu0 %339  ;;  %v944_v45 = vmul.f32 %v816_v12, %v1717_v48  ;;  %v815_v28 = vsel %vm559_vm9, %v1247_v23, 1.0  ;;  %1256 = vrsqrt.f32 %v342_v13  ;;  %vm566_vm14 = vcmp.gt.f32.partialorder %v342_v13, 1.0 }
  0xe1   :  { %v943_v30 = vmul.f32 %v815_v28, %v1719_v49  ;;  %1258 = vrsqrt.f32 %v1835_v44  ;;  %vm565_vm15 = vcmp.gt.f32.partialorder %v1835_v44, 1.0  ;;  %v138_v44 = vld [vmem:[#allocation2 + $0x398] sm:$0xff] }
  0xe2   :  { %v1249_v15 = vpop.eup %1248  ;;  %1072 = vst [vmem:[#allocation5 + $0xc8] sm:$0xff] %v944_v45  ;;  %485 = vadd.xlane.f32.xlu1 %v254_v1  ;;  %483 = vadd.xlane.f32.xlu0 %v253_v22  ;;  %v264_v1 = vmul.f32 %v136_v46, %v136_v46  ;;  %v263_v22 = vmul.f32 %v135_v41, %v135_v41 }
  0xe3   :  { %v1251_v31 = vpop.eup %1250  ;;  %1071 = vst [vmem:[#allocation5 + $0xc0] sm:$0xff] %v943_v30  ;;  %v818_v34 = vsel %vm562_vm10, %v1249_v15, 1.0  ;;  %v346_v2 = vpop.xlane.xlu1 %345  ;;  %v266_v30 = vmul.f32 %v138_v44, %v138_v44 }
  0xe4   :  { %v1841_v48 = vpop.xlane.xlu0 %343  ;;  %v946_v49 = vmul.f32 %v818_v34, %v1725_v52  ;;  %v817_v5 = vsel %vm561_vm11, %v1251_v31, 1.0  ;;  %1260 = vrsqrt.f32 %v346_v2  ;;  %vm568_vm0 = vcmp.gt.f32.partialorder %v346_v2, 1.0  ;;  %v140_v34 = vld [vmem:[#allocation2 + $0x3a8] sm:$0xff] }
  0xe5   :  { %v945_v17 = vmul.f32 %v817_v5, %v1727_v53  ;;  %1262 = vrsqrt.f32 %v1841_v48  ;;  %vm567_vm1 = vcmp.gt.f32.partialorder %v1841_v48, 1.0  ;;  %v1452_v2 = vld [vmem:[#allocation2 + $0x128] sm:$0xff] }
  0xe6   :  { %v1253_v32 = vpop.eup %1252  ;;  %1074 = vst [vmem:[#allocation5 + $0xd8] sm:$0xff] %v946_v49  ;;  %489 = vadd.xlane.f32.xlu1 %v256_v29  ;;  %487 = vadd.xlane.f32.xlu0 %v255_v18 }
  0xe7   :  { %v1255_v33 = vpop.eup %1254  ;;  %1073 = vst [vmem:[#allocation5 + $0xd0] sm:$0xff] %v945_v17  ;;  %v820_v47 = vsel %vm564_vm12, %v1253_v32, 1.0  ;;  %v350_v26 = vpop.xlane.xlu1 %349  ;;  %v268_v17 = vmul.f32 %v140_v34, %v140_v34 }
  0xe8   :  { %v1847_v52 = vpop.xlane.xlu0 %347  ;;  %v948_v53 = vmul.f32 %v820_v47, %v1733_v56  ;;  %v819_v27 = vsel %vm563_vm13, %v1255_v33, 1.0  ;;  %1264 = vrsqrt.f32 %v350_v26  ;;  %vm570_vm2 = vcmp.gt.f32.partialorder %v350_v26, 1.0  ;;  %v142_v26 = vld [vmem:[#allocation2 + $0x3b8] sm:$0xff] }
  0xe9   :  { %v947_v51 = vmul.f32 %v819_v27, %v1735_v57  ;;  %1266 = vrsqrt.f32 %v1847_v52  ;;  %vm569_vm3 = vcmp.gt.f32.partialorder %v1847_v52, 1.0  ;;  %v141_v52 = vld [vmem:[#allocation2 + $0x3b0] sm:$0xff] }
  0xea   :  { %v1257_v20 = vpop.eup %1256  ;;  %1076 = vst [vmem:[#allocation5 + $0xe8] sm:$0xff] %v948_v53  ;;  %493 = vadd.xlane.f32.xlu1 %v258_v42  ;;  %491 = vadd.xlane.f32.xlu0 %v257_v35  ;;  %v1455_v27 = vld [vmem:[#allocation2 + $0x130] sm:$0xff] }
  0xeb   :  { %v1259_v58 = vpop.eup %1258  ;;  %1075 = vst [vmem:[#allocation5 + $0xe0] sm:$0xff] %v947_v51  ;;  %v822_v21 = vsel %vm566_vm14, %v1257_v20, 1.0  ;;  %v354_v37 = vpop.xlane.xlu1 %353 }
  0xec   :  { %v1853_v56 = vpop.xlane.xlu0 %351  ;;  %v950_v57 = vmul.f32 %v822_v21, %v1741_v60  ;;  %v821_v9 = vsel %vm565_vm15, %v1259_v58, 1.0  ;;  %1268 = vrsqrt.f32 %v354_v37  ;;  %vm572_vm4 = vcmp.gt.f32.partialorder %v354_v37, 1.0 }
  0xed   :  { %v949_v59 = vmul.f32 %v821_v9, %v1743_v61  ;;  %1270 = vrsqrt.f32 %v1853_v56  ;;  %vm571_vm5 = vcmp.gt.f32.partialorder %v1853_v56, 1.0 }
  0xee   :  { %v1261_v8 = vpop.eup %1260  ;;  %1078 = vst [vmem:[#allocation5 + $0xf8] sm:$0xff] %v950_v57  ;;  %497 = vadd.xlane.f32.xlu1 %v260_v54  ;;  %495 = vadd.xlane.f32.xlu0 %v259_v36  ;;  %v270_v54 = vmul.f32 %v142_v26, %v142_v26  ;;  %v269_v36 = vmul.f32 %v141_v52, %v141_v52  ;;  %v1456_v57 = vld [vmem:[#allocation2 + $0x148] sm:$0xff] }
  0xef   :  { %v1263_v6 = vpop.eup %1262  ;;  %1077 = vst [vmem:[#allocation5 + $0xf0] sm:$0xff] %v949_v59  ;;  %v824_v40 = vsel %vm568_vm0, %v1261_v8, 1.0  ;;  %v358_v24 = vpop.xlane.xlu1 %357  ;;  %v1457_v8 = vld [vmem:[#allocation2 + $0x140] sm:$0xff] }
  0xf0   :  { %v1859_v60 = vpop.xlane.xlu0 %355  ;;  %v952_v61 = vmul.f32 %v824_v40, %v1749_v3  ;;  %v823_v0 = vsel %vm567_vm1, %v1263_v6, 1.0  ;;  %1272 = vrsqrt.f32 %v358_v24  ;;  %vm574_vm6 = vcmp.gt.f32.partialorder %v358_v24, 1.0 }
  0xf1   :  { %v951_v25 = vmul.f32 %v823_v0, %v1751_v4  ;;  %1274 = vrsqrt.f32 %v1859_v60  ;;  %v137_v4 = vld [vmem:[#allocation2 + $0x390] sm:$0xff]  ;;  %vm573_vm7 = vcmp.gt.f32.partialorder %v1859_v60, 1.0  ;;  %v272_v6 = vmul.f32 %v144_v62, %v144_v62 }
  0xf2   :  { %v1265_v19 = vpop.eup %1264  ;;  %1080 = vst [vmem:[#allocation5 + $0x108] sm:$0xff] %v952_v61  ;;  %501 = vadd.xlane.f32.xlu1 %v262_v43  ;;  %499 = vadd.xlane.f32.xlu0 %v261_v63  ;;  %v265_v15 = vmul.f32 %v137_v4, %v137_v4  ;;  %v271_v40 = vmul.f32 %v143_v55, %v143_v55  ;;  %v146_v61 = vld [vmem:[#allocation2 + $0x3d8] sm:$0xff]  ;;  %v145_v0 = vld [vmem:[#allocation2 + $0x3d0] sm:$0xff] }
  0xf3   :  { %v1267_v23 = vpop.eup %1266  ;;  %1079 = vst [vmem:[#allocation5 + $0x100] sm:$0xff] %v951_v25  ;;  %v826_v12 = vsel %vm570_vm2, %v1265_v19, 1.0  ;;  %v1865_v13 = vpop.xlane.xlu1 %361  ;;  %v1458_v25 = vld [vmem:[#allocation2 + $0x158] sm:$0xff] }
  0xf4   :  { %v1867_v3 = vpop.xlane.xlu0 %359  ;;  %v954_v14 = vmul.f32 %v826_v12, %v1757_v10  ;;  %v825_v7 = vsel %vm569_vm3, %v1267_v23, 1.0  ;;  %1276 = vrsqrt.f32 %v1865_v13  ;;  %vm576_vm8 = vcmp.gt.f32.partialorder %v1865_v13, 1.0 }
  0xf5   :  { %v953_v45 = vmul.f32 %v825_v7, %v1759_v11  ;;  %1278 = vrsqrt.f32 %v1867_v3  ;;  %v139_v11 = vld [vmem:[#allocation2 + $0x3a0] sm:$0xff]  ;;  %vm575_vm9 = vcmp.gt.f32.partialorder %v1867_v3, 1.0  ;;  %v274_v13 = vmul.f32 %v146_v61, %v146_v61 }
  0xf6   :  { %v1269_v28 = vpop.eup %1268  ;;  %1082 = vst [vmem:[#allocation5 + $0x118] sm:$0xff] %v954_v14  ;;  %505 = vadd.xlane.f32.xlu1 %v264_v1  ;;  %503 = vadd.xlane.f32.xlu0 %v263_v22  ;;  %v267_v32 = vmul.f32 %v139_v11, %v139_v11  ;;  %v1459_v22 = vld [vmem:[#allocation2 + $0x150] sm:$0xff]  ;;  %v273_v3 = vmul.f32 %v145_v0, %v145_v0  ;;  %v1469_v0 = vld [vmem:[#allocation2 + $0x1a0] sm:$0xff] }
  0xf7   :  { %v1271_v29 = vpop.eup %1270  ;;  %1081 = vst [vmem:[#allocation5 + $0x110] sm:$0xff] %v953_v45  ;;  %v828_v18 = vsel %vm572_vm4, %v1269_v28, 1.0  ;;  %v1874_v10 = vpop.xlane.xlu1 %365  ;;  %v148_v45 = vld [vmem:[#allocation2 + $0x3e8] sm:$0xff]  ;;  %v147_v28 = vld [vmem:[#allocation2 + $0x3e0] sm:$0xff] }
  0xf8   :  { %v1876_v31 = vpop.xlane.xlu0 %363  ;;  %v956_v48 = vmul.f32 %v1452_v2, %v828_v18  ;;  %v827_v16 = vsel %vm571_vm5, %v1271_v29, 1.0  ;;  %1280 = vrsqrt.f32 %v1874_v10  ;;  %vm578_vm10 = vcmp.gt.f32.partialorder %v1874_v10, 1.0  ;;  %v1461_v18 = vld [vmem:[#allocation2 + $0x160] sm:$0xff] }
  0xf9   :  { %v955_v49 = vmul.f32 %v1453_v39, %v827_v16  ;;  %1282 = vrsqrt.f32 %v1876_v31  ;;  %vm577_vm11 = vcmp.gt.f32.partialorder %v1876_v31, 1.0  ;;  %v276_v34 = vmul.f32 %v148_v45, %v148_v45 }
  0xfa   :  { %v1273_v5 = vpop.eup %1272  ;;  %1084 = vst [vmem:[#allocation5 + $0x128] sm:$0xff] %v956_v48  ;;  %509 = vadd.xlane.f32.xlu1 %v266_v30  ;;  %507 = vadd.xlane.f32.xlu0 %v265_v15  ;;  %v1460_v30 = vld [vmem:[#allocation2 + $0x168] sm:$0xff]  ;;  %v275_v11 = vmul.f32 %v147_v28, %v147_v28 }
  0xfb   :  { %v1275_v42 = vpop.eup %1274  ;;  %1083 = vst [vmem:[#allocation5 + $0x120] sm:$0xff] %v955_v49  ;;  %v830_v35 = vsel %vm574_vm6, %v1273_v5, 1.0  ;;  %v1881_v33 = vpop.xlane.xlu1 %369  ;;  %v150_v49 = vld [vmem:[#allocation2 + $0x3f8] sm:$0xff]  ;;  %v149_v5 = vld [vmem:[#allocation2 + $0x3f0] sm:$0xff] }
  0xfc   :  { %v1883_v47 = vpop.xlane.xlu0 %367  ;;  %v958_v50 = vmul.f32 %v1454_v38, %v830_v35  ;;  %v829_v53 = vsel %vm573_vm7, %v1275_v42, 1.0  ;;  %1284 = vrsqrt.f32 %v1881_v33  ;;  %vm580_vm12 = vcmp.gt.f32.partialorder %v1881_v33, 1.0  ;;  %v1463_v35 = vld [vmem:[#allocation2 + $0x170] sm:$0xff] }
  0xfd   :  { %v957_v51 = vmul.f32 %v1455_v27, %v829_v53  ;;  %1286 = vrsqrt.f32 %v1883_v47  ;;  %vm579_vm13 = vcmp.gt.f32.partialorder %v1883_v47, 1.0  ;;  %v278_v26 = vmul.f32 %v150_v49, %v150_v49  ;;  %v1474_v49 = vld [vmem:[#allocation2 + $0x1d8] sm:$0xff] }
  0xfe   :  { %v1277_v20 = vpop.eup %1276  ;;  %1086 = vst [vmem:[#allocation5 + $0x138] sm:$0xff] %v958_v50  ;;  %513 = vadd.xlane.f32.xlu1 %v268_v17  ;;  %511 = vadd.xlane.f32.xlu0 %v267_v32  ;;  %v1462_v17 = vld [vmem:[#allocation2 + $0x178] sm:$0xff]  ;;  %v277_v52 = vmul.f32 %v149_v5, %v149_v5 }
  0xff   :  { %v1279_v58 = vpop.eup %1278  ;;  %1085 = vst [vmem:[#allocation5 + $0x130] sm:$0xff] %v957_v51  ;;  %v832_v21 = vsel %vm576_vm8, %v1277_v20, 1.0  ;;  %v1889_v37 = vpop.xlane.xlu1 %373  ;;  %v1464_v51 = vld [vmem:[#allocation2 + $0x188] sm:$0xff] }
 0x100   :  { %v1891_v56 = vpop.xlane.xlu0 %371  ;;  %v960_v9 = vmul.f32 %v1456_v57, %v832_v21  ;;  %v831_v59 = vsel %vm575_vm9, %v1279_v58, 1.0  ;;  %1288 = vrsqrt.f32 %v1889_v37  ;;  %vm582_vm14 = vcmp.gt.f32.partialorder %v1889_v37, 1.0  ;;  %v1466_v57 = vld [vmem:[#allocation2 + $0x198] sm:$0xff] }
 0x101   :  { %v959_v43 = vmul.f32 %v1457_v8, %v831_v59  ;;  %1290 = vrsqrt.f32 %v1891_v56  ;;  %vm581_vm15 = vcmp.gt.f32.partialorder %v1891_v56, 1.0  ;;  %v1467_v8 = vld [vmem:[#allocation2 + $0x190] sm:$0xff] }
 0x102   :  { %v1281_v63 = vpop.eup %1280  ;;  %1088 = vst [vmem:[#allocation5 + $0x148] sm:$0xff] %v960_v9  ;;  %517 = vadd.xlane.f32.xlu1 %v270_v54  ;;  %515 = vadd.xlane.f32.xlu0 %v269_v36  ;;  %v1465_v36 = vld [vmem:[#allocation2 + $0x180] sm:$0xff] }
 0x103   :  { %v1283_v24 = vpop.eup %1282  ;;  %1087 = vst [vmem:[#allocation5 + $0x140] sm:$0xff] %v959_v43  ;;  %v834_v60 = vsel %vm578_vm10, %v1281_v63, 1.0  ;;  %v1897_v46 = vpop.xlane.xlu1 %377 }
 0x104   :  { %v1899_v41 = vpop.xlane.xlu0 %375  ;;  %v962_v19 = vmul.f32 %v1458_v25, %v834_v60  ;;  %v833_v1 = vsel %vm577_vm11, %v1283_v24, 1.0  ;;  %1292 = vrsqrt.f32 %v1897_v46  ;;  %vm584_vm0 = vcmp.gt.f32.partialorder %v1897_v46, 1.0  ;;  %v1468_v46 = vld [vmem:[#allocation2 + $0x1a8] sm:$0xff] }
 0x105   :  { %v961_v23 = vmul.f32 %v1459_v22, %v833_v1  ;;  %1294 = vrsqrt.f32 %v1899_v41  ;;  %vm583_vm1 = vcmp.gt.f32.partialorder %v1899_v41, 1.0 }
 0x106   :  { %v1285_v12 = vpop.eup %1284  ;;  %1090 = vst [vmem:[#allocation5 + $0x158] sm:$0xff] %v962_v19  ;;  %521 = vadd.xlane.f32.xlu1 %v272_v6  ;;  %519 = vadd.xlane.f32.xlu0 %v271_v40 }
 0x107   :  { %v1287_v44 = vpop.eup %1286  ;;  %1089 = vst [vmem:[#allocation5 + $0x150] sm:$0xff] %v961_v23  ;;  %v836_v4 = vsel %vm580_vm12, %v1285_v12, 1.0  ;;  %v382_v14 = vpop.xlane.xlu1 %381 }
 0x108   :  { %v1905_v7 = vpop.xlane.xlu0 %379  ;;  %v964_v15 = vmul.f32 %v1460_v30, %v836_v4  ;;  %v835_v29 = vsel %vm579_vm13, %v1287_v44, 1.0  ;;  %1296 = vrsqrt.f32 %v382_v14  ;;  %vm586_vm2 = vcmp.gt.f32.partialorder %v382_v14, 1.0  ;;  %v1471_v4 = vld [vmem:[#allocation2 + $0x1b0] sm:$0xff] }
 0x109   :  { %v963_v10 = vmul.f32 %v1461_v18, %v835_v29  ;;  %1298 = vrsqrt.f32 %v1905_v7  ;;  %vm585_vm3 = vcmp.gt.f32.partialorder %v1905_v7, 1.0  ;;  %v1472_v29 = vld [vmem:[#allocation2 + $0x1c8] sm:$0xff] }
 0x10a   :  { %v1289_v31 = vpop.eup %1288  ;;  %1092 = vst [vmem:[#allocation5 + $0x168] sm:$0xff] %v964_v15  ;;  %525 = vadd.xlane.f32.xlu1 %v274_v13  ;;  %523 = vadd.xlane.f32.xlu0 %v273_v3  ;;  %v1470_v13 = vld [vmem:[#allocation2 + $0x1b8] sm:$0xff] }
 0x10b   :  { %v1291_v2 = vpop.eup %1290  ;;  %1091 = vst [vmem:[#allocation5 + $0x160] sm:$0xff] %v963_v10  ;;  %v838_v48 = vsel %vm582_vm14, %v1289_v31, 1.0  ;;  %v386_v16 = vpop.xlane.xlu1 %385  ;;  %v1473_v31 = vld [vmem:[#allocation2 + $0x1c0] sm:$0xff] }
 0x10c   :  { %v384_v39 = vpop.xlane.xlu0 %383  ;;  %v966_v32 = vmul.f32 %v1462_v17, %v838_v48  ;;  %v837_v42 = vsel %vm581_vm15, %v1291_v2, 1.0  ;;  %1300 = vrsqrt.f32 %v386_v16  ;;  %vm588_vm4 = vcmp.gt.f32.partialorder %v386_v16, 1.0 }
 0x10d   :  { %v965_v33 = vmul.f32 %v1463_v35, %v837_v42  ;;  %1302 = vrsqrt.f32 %v384_v39  ;;  %vm587_vm5 = vcmp.gt.f32.partialorder %v384_v39, 1.0 }
 0x10e   :  { %v1293_v47 = vpop.eup %1292  ;;  %1094 = vst [vmem:[#allocation5 + $0x178] sm:$0xff] %v966_v32  ;;  %529 = vadd.xlane.f32.xlu1 %v276_v34  ;;  %527 = vadd.xlane.f32.xlu0 %v275_v11  ;;  %v1475_v32 = vld [vmem:[#allocation2 + $0x1d0] sm:$0xff] }
 0x10f   :  { %v1295_v38 = vpop.eup %1294  ;;  %1093 = vst [vmem:[#allocation5 + $0x170] sm:$0xff] %v965_v33  ;;  %v840_v50 = vsel %vm584_vm0, %v1293_v47, 1.0  ;;  %v390_v53 = vpop.xlane.xlu1 %389 }
 0x110   :  { %v388_v27 = vpop.xlane.xlu0 %387  ;;  %v968_v20 = vmul.f32 %v1464_v51, %v840_v50  ;;  %v839_v54 = vsel %vm583_vm1, %v1295_v38, 1.0  ;;  %1304 = vrsqrt.f32 %v390_v53  ;;  %vm590_vm6 = vcmp.gt.f32.partialorder %v390_v53, 1.0  ;;  %v1476_v38 = vld [vmem:[#allocation2 + $0x1e8] sm:$0xff] }
 0x111   :  { %v967_v58 = vmul.f32 %v1465_v36, %v839_v54  ;;  %1306 = vrsqrt.f32 %v388_v27  ;;  %vm589_vm7 = vcmp.gt.f32.partialorder %v388_v27, 1.0  ;;  %v1477_v27 = vld [vmem:[#allocation2 + $0x1e0] sm:$0xff] }
 0x112   :  { %v1297_v21 = vpop.eup %1296  ;;  %1096 = vst [vmem:[#allocation5 + $0x188] sm:$0xff] %v968_v20  ;;  %533 = vadd.xlane.f32.xlu1 %v278_v26  ;;  %531 = vadd.xlane.f32.xlu0 %v277_v52 }
 0x113   :  { %v1299_v37 = vpop.eup %1298  ;;  %1095 = vst [vmem:[#allocation5 + $0x180] sm:$0xff] %v967_v58  ;;  %v842_v56 = vsel %vm586_vm2, %v1297_v21, 1.0  ;;  %v394_v62 = vpop.xlane.xlu1 %393 }
 0x114   :  { %v392_v55 = vpop.xlane.xlu0 %391  ;;  %v970_v9 = vmul.f32 %v1466_v57, %v842_v56  ;;  %v841_v59 = vsel %vm585_vm3, %v1299_v37, 1.0  ;;  %1308 = vrsqrt.f32 %v394_v62  ;;  %vm592_vm8 = vcmp.gt.f32.partialorder %v394_v62, 1.0  ;;  %v1478_v37 = vld [vmem:[#allocation2 + $0x1f8] sm:$0xff] }
 0x115   :  { %v969_v43 = vmul.f32 %v1467_v8, %v841_v59  ;;  %1310 = vrsqrt.f32 %v392_v55  ;;  %vm591_vm9 = vcmp.gt.f32.partialorder %v392_v55, 1.0  ;;  %v1479_v55 = vld [vmem:[#allocation2 + $0x1f0] sm:$0xff] }
 0x116   :  { %v1301_v63 = vpop.eup %1300  ;;  %1098 = vst [vmem:[#allocation5 + $0x198] sm:$0xff] %v970_v9 }
 0x117   :  { %v1303_v6 = vpop.eup %1302  ;;  %1097 = vst [vmem:[#allocation5 + $0x190] sm:$0xff] %v969_v43  ;;  %v844_v40 = vsel %vm588_vm4, %v1301_v63, 1.0  ;;  %v398_v24 = vpop.xlane.xlu1 %397 }
 0x118   :  { %v396_v60 = vpop.xlane.xlu0 %395  ;;  %v972_v41 = vmul.f32 %v1468_v46, %v844_v40  ;;  %v843_v61 = vsel %vm587_vm5, %v1303_v6, 1.0  ;;  %1312 = vrsqrt.f32 %v398_v24  ;;  %vm594_vm10 = vcmp.gt.f32.partialorder %v398_v24, 1.0  ;;  %v1480_v6 = vld [vmem:[#allocation2 + $0x208] sm:$0xff] }
 0x119   :  { %v971_v25 = vmul.f32 %v1469_v0, %v843_v61  ;;  %1314 = vrsqrt.f32 %v396_v60  ;;  %vm593_vm11 = vcmp.gt.f32.partialorder %v396_v60, 1.0  ;;  %v1481_v60 = vld [vmem:[#allocation2 + $0x200] sm:$0xff] }
 0x11a   :  { %v1305_v19 = vpop.eup %1304  ;;  %1100 = vst [vmem:[#allocation5 + $0x1a8] sm:$0xff] %v972_v41 }
 0x11b   :  { %v1307_v1 = vpop.eup %1306  ;;  %1099 = vst [vmem:[#allocation5 + $0x1a0] sm:$0xff] %v971_v25  ;;  %v846_v22 = vsel %vm590_vm6, %v1305_v19, 1.0  ;;  %v402_v23 = vpop.xlane.xlu1 %401 }
 0x11c   :  { %v400_v12 = vpop.xlane.xlu0 %399  ;;  %v974_v3 = vmul.f32 %v1470_v13, %v846_v22  ;;  %v845_v44 = vsel %vm589_vm7, %v1307_v1, 1.0  ;;  %1316 = vrsqrt.f32 %v402_v23  ;;  %vm596_vm12 = vcmp.gt.f32.partialorder %v402_v23, 1.0  ;;  %v1482_v1 = vld [vmem:[#allocation2 + $0x218] sm:$0xff] }
 0x11d   :  { %v973_v14 = vmul.f32 %v1471_v4, %v845_v44  ;;  %1318 = vrsqrt.f32 %v400_v12  ;;  %vm595_vm13 = vcmp.gt.f32.partialorder %v400_v12, 1.0  ;;  %v1483_v12 = vld [vmem:[#allocation2 + $0x210] sm:$0xff] }
 0x11e   :  { %v1309_v7 = vpop.eup %1308  ;;  %1102 = vst [vmem:[#allocation5 + $0x1b8] sm:$0xff] %v974_v3 }
 0x11f   :  { %v1311_v45 = vpop.eup %1310  ;;  %1101 = vst [vmem:[#allocation5 + $0x1b0] sm:$0xff] %v973_v14  ;;  %v848_v28 = vsel %vm592_vm8, %v1309_v7, 1.0  ;;  %v406_v30 = vpop.xlane.xlu1 %405 }
 0x120   :  { %v404_v15 = vpop.xlane.xlu0 %403  ;;  %v976_v18 = vmul.f32 %v1472_v29, %v848_v28  ;;  %v847_v10 = vsel %vm591_vm9, %v1311_v45, 1.0  ;;  %1320 = vrsqrt.f32 %v406_v30  ;;  %vm598_vm14 = vcmp.gt.f32.partialorder %v406_v30, 1.0  ;;  %v1484_v45 = vld [vmem:[#allocation2 + $0x228] sm:$0xff] }
 0x121   :  { %v975_v34 = vmul.f32 %v1473_v31, %v847_v10  ;;  %1322 = vrsqrt.f32 %v404_v15  ;;  %vm597_vm15 = vcmp.gt.f32.partialorder %v404_v15, 1.0  ;;  %v1485_v15 = vld [vmem:[#allocation2 + $0x220] sm:$0xff] }
 0x122   :  { %v1313_v11 = vpop.eup %1312  ;;  %1104 = vst [vmem:[#allocation5 + $0x1c8] sm:$0xff] %v976_v18 }
 0x123   :  { %v1315_v2 = vpop.eup %1314  ;;  %1103 = vst [vmem:[#allocation5 + $0x1c0] sm:$0xff] %v975_v34  ;;  %v850_v48 = vsel %vm594_vm10, %v1313_v11, 1.0  ;;  %v410_v16 = vpop.xlane.xlu1 %409 }
 0x124   :  { %v408_v39 = vpop.xlane.xlu0 %407  ;;  %v978_v5 = vmul.f32 %v1474_v49, %v850_v48  ;;  %v849_v17 = vsel %vm593_vm11, %v1315_v2, 1.0  ;;  %1324 = vrsqrt.f32 %v410_v16  ;;  %vm600_vm0 = vcmp.gt.f32.partialorder %v410_v16, 1.0  ;;  %v1486_v2 = vld [vmem:[#allocation2 + $0x238] sm:$0xff] }
 0x125   :  { %v977_v42 = vmul.f32 %v1475_v32, %v849_v17  ;;  %1326 = vrsqrt.f32 %v408_v39  ;;  %vm599_vm1 = vcmp.gt.f32.partialorder %v408_v39, 1.0  ;;  %v1487_v39 = vld [vmem:[#allocation2 + $0x230] sm:$0xff] }
 0x126   :  { %v1317_v35 = vpop.eup %1316  ;;  %1106 = vst [vmem:[#allocation5 + $0x1d8] sm:$0xff] %v978_v5 }
 0x127   :  { %v1319_v33 = vpop.eup %1318  ;;  %1105 = vst [vmem:[#allocation5 + $0x1d0] sm:$0xff] %v977_v42  ;;  %v852_v47 = vsel %vm596_vm12, %v1317_v35, 1.0  ;;  %v414_v26 = vpop.xlane.xlu1 %413 }
 0x128   :  { %v412_v52 = vpop.xlane.xlu0 %411  ;;  %v980_v50 = vmul.f32 %v1476_v38, %v852_v47  ;;  %v851_v53 = vsel %vm595_vm13, %v1319_v33, 1.0  ;;  %1328 = vrsqrt.f32 %v414_v26  ;;  %vm602_vm2 = vcmp.gt.f32.partialorder %v414_v26, 1.0  ;;  %v1488_v33 = vld [vmem:[#allocation2 + $0x248] sm:$0xff] }
 0x129   :  { %v979_v51 = vmul.f32 %v1477_v27, %v851_v53  ;;  %1330 = vrsqrt.f32 %v412_v52  ;;  %vm601_vm3 = vcmp.gt.f32.partialorder %v412_v52, 1.0  ;;  %v1489_v52 = vld [vmem:[#allocation2 + $0x240] sm:$0xff] }
 0x12a   :  { %v1321_v20 = vpop.eup %1320  ;;  %1108 = vst [vmem:[#allocation5 + $0x1e8] sm:$0xff] %v980_v50 }
 0x12b   :  { %v1323_v54 = vpop.eup %1322  ;;  %1107 = vst [vmem:[#allocation5 + $0x1e0] sm:$0xff] %v979_v51  ;;  %v854_v36 = vsel %vm598_vm14, %v1321_v20, 1.0  ;;  %v418_v58 = vpop.xlane.xlu1 %417 }
 0x12c   :  { %v416_v21 = vpop.xlane.xlu0 %415  ;;  %v982_v56 = vmul.f32 %v1478_v37, %v854_v36  ;;  %v853_v62 = vsel %vm597_vm15, %v1323_v54, 1.0  ;;  %1332 = vrsqrt.f32 %v418_v58  ;;  %vm604_vm4 = vcmp.gt.f32.partialorder %v418_v58, 1.0  ;;  %v1490_v54 = vld [vmem:[#allocation2 + $0x258] sm:$0xff] }
 0x12d   :  { %v981_v57 = vmul.f32 %v1479_v55, %v853_v62  ;;  %1334 = vrsqrt.f32 %v416_v21  ;;  %vm603_vm5 = vcmp.gt.f32.partialorder %v416_v21, 1.0  ;;  %v1491_v21 = vld [vmem:[#allocation2 + $0x250] sm:$0xff] }
 0x12e   :  { %v1325_v9 = vpop.eup %1324  ;;  %1110 = vst [vmem:[#allocation5 + $0x1f8] sm:$0xff] %v982_v56 }
 0x12f   :  { %v1327_v59 = vpop.eup %1326  ;;  %1109 = vst [vmem:[#allocation5 + $0x1f0] sm:$0xff] %v981_v57  ;;  %v856_v8 = vsel %vm600_vm0, %v1325_v9, 1.0  ;;  %v422_v43 = vpop.xlane.xlu1 %421 }
 0x130   :  { %v420_v63 = vpop.xlane.xlu0 %419  ;;  %v984_v40 = vmul.f32 %v1480_v6, %v856_v8  ;;  %v855_v24 = vsel %vm599_vm1, %v1327_v59, 1.0  ;;  %1336 = vrsqrt.f32 %v422_v43  ;;  %vm606_vm6 = vcmp.gt.f32.partialorder %v422_v43, 1.0  ;;  %v1492_v59 = vld [vmem:[#allocation2 + $0x268] sm:$0xff] }
 0x131   :  { %v983_v46 = vmul.f32 %v1481_v60, %v855_v24  ;;  %1338 = vrsqrt.f32 %v420_v63  ;;  %vm605_vm7 = vcmp.gt.f32.partialorder %v420_v63, 1.0  ;;  %v1493_v63 = vld [vmem:[#allocation2 + $0x260] sm:$0xff] }
 0x132   :  { %v1329_v41 = vpop.eup %1328  ;;  %1112 = vst [vmem:[#allocation5 + $0x208] sm:$0xff] %v984_v40 }
 0x133   :  { %v1331_v61 = vpop.eup %1330  ;;  %1111 = vst [vmem:[#allocation5 + $0x200] sm:$0xff] %v983_v46  ;;  %v858_v0 = vsel %vm602_vm2, %v1329_v41, 1.0  ;;  %v426_v25 = vpop.xlane.xlu1 %425 }
 0x134   :  { %v424_v19 = vpop.xlane.xlu0 %423  ;;  %v986_v22 = vmul.f32 %v1482_v1, %v858_v0  ;;  %v857_v23 = vsel %vm601_vm3, %v1331_v61, 1.0  ;;  %1340 = vrsqrt.f32 %v426_v25  ;;  %vm608_vm8 = vcmp.gt.f32.partialorder %v426_v25, 1.0  ;;  %v1494_v61 = vld [vmem:[#allocation2 + $0x278] sm:$0xff] }
 0x135   :  { %v985_v13 = vmul.f32 %v1483_v12, %v857_v23  ;;  %1342 = vrsqrt.f32 %v424_v19  ;;  %vm607_vm9 = vcmp.gt.f32.partialorder %v424_v19, 1.0  ;;  %v1495_v19 = vld [vmem:[#allocation2 + $0x270] sm:$0xff] }
 0x136   :  { %v1333_v3 = vpop.eup %1332  ;;  %1114 = vst [vmem:[#allocation5 + $0x218] sm:$0xff] %v986_v22 }
 0x137   :  { %v1335_v44 = vpop.eup %1334  ;;  %1113 = vst [vmem:[#allocation5 + $0x210] sm:$0xff] %v985_v13  ;;  %v860_v4 = vsel %vm604_vm4, %v1333_v3, 1.0  ;;  %v430_v14 = vpop.xlane.xlu1 %429 }
 0x138   :  { %v428_v7 = vpop.xlane.xlu0 %427  ;;  %v988_v28 = vmul.f32 %v1484_v45, %v860_v4  ;;  %v859_v30 = vsel %vm603_vm5, %v1335_v44, 1.0  ;;  %1344 = vrsqrt.f32 %v430_v14  ;;  %vm610_vm10 = vcmp.gt.f32.partialorder %v430_v14, 1.0  ;;  %v1496_v44 = vld [vmem:[#allocation2 + $0x288] sm:$0xff] }
 0x139   :  { %v987_v29 = vmul.f32 %v1485_v15, %v859_v30  ;;  %1346 = vrsqrt.f32 %v428_v7  ;;  %vm609_vm11 = vcmp.gt.f32.partialorder %v428_v7, 1.0  ;;  %v1497_v7 = vld [vmem:[#allocation2 + $0x280] sm:$0xff] }
 0x13a   :  { %v1337_v18 = vpop.eup %1336  ;;  %1116 = vst [vmem:[#allocation5 + $0x228] sm:$0xff] %v988_v28 }
 0x13b   :  { %v1339_v10 = vpop.eup %1338  ;;  %1115 = vst [vmem:[#allocation5 + $0x220] sm:$0xff] %v987_v29  ;;  %v862_v31 = vsel %vm606_vm6, %v1337_v18, 1.0  ;;  %v434_v34 = vpop.xlane.xlu1 %433 }
 0x13c   :  { %v432_v11 = vpop.xlane.xlu0 %431  ;;  %v990_v48 = vmul.f32 %v1486_v2, %v862_v31  ;;  %v861_v16 = vsel %vm605_vm7, %v1339_v10, 1.0  ;;  %1348 = vrsqrt.f32 %v434_v34  ;;  %vm612_vm12 = vcmp.gt.f32.partialorder %v434_v34, 1.0  ;;  %v1498_v10 = vld [vmem:[#allocation2 + $0x298] sm:$0xff] }
 0x13d   :  { %v989_v49 = vmul.f32 %v1487_v39, %v861_v16  ;;  %1350 = vrsqrt.f32 %v432_v11  ;;  %vm611_vm13 = vcmp.gt.f32.partialorder %v432_v11, 1.0  ;;  %v1499_v11 = vld [vmem:[#allocation2 + $0x290] sm:$0xff] }
 0x13e   :  { %v1341_v5 = vpop.eup %1340  ;;  %1118 = vst [vmem:[#allocation5 + $0x238] sm:$0xff] %v990_v48 }
 0x13f   :  { %v1343_v17 = vpop.eup %1342  ;;  %1117 = vst [vmem:[#allocation5 + $0x230] sm:$0xff] %v989_v49  ;;  %v864_v32 = vsel %vm608_vm8, %v1341_v5, 1.0  ;;  %v438_v42 = vpop.xlane.xlu1 %437 }
 0x140   :  { %v436_v35 = vpop.xlane.xlu0 %435  ;;  %v992_v47 = vmul.f32 %v1488_v33, %v864_v32  ;;  %v863_v26 = vsel %vm607_vm9, %v1343_v17, 1.0  ;;  %1352 = vrsqrt.f32 %v438_v42  ;;  %vm614_vm14 = vcmp.gt.f32.partialorder %v438_v42, 1.0  ;;  %v1500_v17 = vld [vmem:[#allocation2 + $0x2a8] sm:$0xff] }
 0x141   :  { %v991_v38 = vmul.f32 %v1489_v52, %v863_v26  ;;  %1354 = vrsqrt.f32 %v436_v35  ;;  %vm613_vm15 = vcmp.gt.f32.partialorder %v436_v35, 1.0  ;;  %v1501_v35 = vld [vmem:[#allocation2 + $0x2a0] sm:$0xff] }
 0x142   :  { %v1345_v50 = vpop.eup %1344  ;;  %1120 = vst [vmem:[#allocation5 + $0x248] sm:$0xff] %v992_v47 }
 0x143   :  { %v1347_v53 = vpop.eup %1346  ;;  %1119 = vst [vmem:[#allocation5 + $0x240] sm:$0xff] %v991_v38  ;;  %v866_v27 = vsel %vm610_vm10, %v1345_v50, 1.0  ;;  %v442_v51 = vpop.xlane.xlu1 %441 }
 0x144   :  { %v440_v20 = vpop.xlane.xlu0 %439  ;;  %v994_v36 = vmul.f32 %v1490_v54, %v866_v27  ;;  %v865_v58 = vsel %vm609_vm11, %v1347_v53, 1.0  ;;  %1356 = vrsqrt.f32 %v442_v51  ;;  %vm616_vm0 = vcmp.gt.f32.partialorder %v442_v51, 1.0  ;;  %v1502_v53 = vld [vmem:[#allocation2 + $0x2b8] sm:$0xff] }
 0x145   :  { %v993_v37 = vmul.f32 %v1491_v21, %v865_v58  ;;  %1358 = vrsqrt.f32 %v440_v20  ;;  %vm615_vm1 = vcmp.gt.f32.partialorder %v440_v20, 1.0  ;;  %v1503_v20 = vld [vmem:[#allocation2 + $0x2b0] sm:$0xff] }
 0x146   :  { %v1349_v56 = vpop.eup %1348  ;;  %1122 = vst [vmem:[#allocation5 + $0x258] sm:$0xff] %v994_v36 }
 0x147   :  { %v1351_v62 = vpop.eup %1350  ;;  %1121 = vst [vmem:[#allocation5 + $0x250] sm:$0xff] %v993_v37  ;;  %v868_v55 = vsel %vm612_vm12, %v1349_v56, 1.0  ;;  %v446_v57 = vpop.xlane.xlu1 %445 }
 0x148   :  { %v444_v9 = vpop.xlane.xlu0 %443  ;;  %v996_v8 = vmul.f32 %v1492_v59, %v868_v55  ;;  %v867_v43 = vsel %vm611_vm13, %v1351_v62, 1.0  ;;  %1360 = vrsqrt.f32 %v446_v57  ;;  %vm618_vm2 = vcmp.gt.f32.partialorder %v446_v57, 1.0  ;;  %v1504_v62 = vld [vmem:[#allocation2 + $0x2c8] sm:$0xff] }
 0x149   :  { %v995_v6 = vmul.f32 %v1493_v63, %v867_v43  ;;  %1362 = vrsqrt.f32 %v444_v9  ;;  %vm617_vm3 = vcmp.gt.f32.partialorder %v444_v9, 1.0  ;;  %v1505_v9 = vld [vmem:[#allocation2 + $0x2c0] sm:$0xff] }
 0x14a   :  { %v1353_v40 = vpop.eup %1352  ;;  %1124 = vst [vmem:[#allocation5 + $0x268] sm:$0xff] %v996_v8 }
 0x14b   :  { %v1355_v24 = vpop.eup %1354  ;;  %1123 = vst [vmem:[#allocation5 + $0x260] sm:$0xff] %v995_v6  ;;  %v870_v60 = vsel %vm614_vm14, %v1353_v40, 1.0  ;;  %v450_v46 = vpop.xlane.xlu1 %449 }
 0x14c   :  { %v448_v41 = vpop.xlane.xlu0 %447  ;;  %v998_v0 = vmul.f32 %v1494_v61, %v870_v60  ;;  %v869_v25 = vsel %vm613_vm15, %v1355_v24, 1.0  ;;  %1364 = vrsqrt.f32 %v450_v46  ;;  %vm620_vm4 = vcmp.gt.f32.partialorder %v450_v46, 1.0  ;;  %v1506_v24 = vld [vmem:[#allocation2 + $0x2d8] sm:$0xff] }
 0x14d   :  { %v997_v1 = vmul.f32 %v1495_v19, %v869_v25  ;;  %1366 = vrsqrt.f32 %v448_v41  ;;  %vm619_vm5 = vcmp.gt.f32.partialorder %v448_v41, 1.0  ;;  %v1507_v41 = vld [vmem:[#allocation2 + $0x2d0] sm:$0xff] }
 0x14e   :  { %v1357_v22 = vpop.eup %1356  ;;  %1126 = vst [vmem:[#allocation5 + $0x278] sm:$0xff] %v998_v0 }
 0x14f   :  { %v1359_v23 = vpop.eup %1358  ;;  %1125 = vst [vmem:[#allocation5 + $0x270] sm:$0xff] %v997_v1  ;;  %v872_v12 = vsel %vm616_vm0, %v1357_v22, 1.0  ;;  %v454_v13 = vpop.xlane.xlu1 %453 }
 0x150   :  { %v452_v3 = vpop.xlane.xlu0 %451  ;;  %v1000_v4 = vmul.f32 %v1496_v44, %v872_v12  ;;  %v871_v14 = vsel %vm615_vm1, %v1359_v23, 1.0  ;;  %1368 = vrsqrt.f32 %v454_v13  ;;  %vm622_vm6 = vcmp.gt.f32.partialorder %v454_v13, 1.0  ;;  %v1508_v23 = vld [vmem:[#allocation2 + $0x2e8] sm:$0xff] }
 0x151   :  { %v999_v45 = vmul.f32 %v1497_v7, %v871_v14  ;;  %1370 = vrsqrt.f32 %v452_v3  ;;  %vm621_vm7 = vcmp.gt.f32.partialorder %v452_v3, 1.0  ;;  %v1509_v3 = vld [vmem:[#allocation2 + $0x2e0] sm:$0xff] }
 0x152   :  { %v1361_v28 = vpop.eup %1360  ;;  %1128 = vst [vmem:[#allocation5 + $0x288] sm:$0xff] %v1000_v4 }
 0x153   :  { %v1363_v30 = vpop.eup %1362  ;;  %1127 = vst [vmem:[#allocation5 + $0x280] sm:$0xff] %v999_v45  ;;  %v874_v15 = vsel %vm618_vm2, %v1361_v28, 1.0  ;;  %v458_v29 = vpop.xlane.xlu1 %457 }
 0x154   :  { %v456_v18 = vpop.xlane.xlu0 %455  ;;  %v1002_v31 = vmul.f32 %v1498_v10, %v874_v15  ;;  %v873_v34 = vsel %vm617_vm3, %v1363_v30, 1.0  ;;  %1372 = vrsqrt.f32 %v458_v29  ;;  %vm624_vm8 = vcmp.gt.f32.partialorder %v458_v29, 1.0  ;;  %v1510_v30 = vld [vmem:[#allocation2 + $0x2f8] sm:$0xff] }
 0x155   :  { %v1001_v2 = vmul.f32 %v1499_v11, %v873_v34  ;;  %1374 = vrsqrt.f32 %v456_v18  ;;  %vm623_vm9 = vcmp.gt.f32.partialorder %v456_v18, 1.0  ;;  %v1511_v18 = vld [vmem:[#allocation2 + $0x2f0] sm:$0xff] }
 0x156   :  { %v1365_v48 = vpop.eup %1364  ;;  %1130 = vst [vmem:[#allocation5 + $0x298] sm:$0xff] %v1002_v31 }
 0x157   :  { %v1367_v16 = vpop.eup %1366  ;;  %1129 = vst [vmem:[#allocation5 + $0x290] sm:$0xff] %v1001_v2  ;;  %v876_v39 = vsel %vm620_vm4, %v1365_v48, 1.0  ;;  %v462_v49 = vpop.xlane.xlu1 %461 }
 0x158   :  { %v460_v5 = vpop.xlane.xlu0 %459  ;;  %v1004_v32 = vmul.f32 %v1500_v17, %v876_v39  ;;  %v875_v42 = vsel %vm619_vm5, %v1367_v16, 1.0  ;;  %1376 = vrsqrt.f32 %v462_v49  ;;  %vm626_vm10 = vcmp.gt.f32.partialorder %v462_v49, 1.0  ;;  %v1512_v16 = vld [vmem:[#allocation2 + $0x308] sm:$0xff] }
 0x159   :  { %v1003_v33 = vmul.f32 %v1501_v35, %v875_v42  ;;  %1378 = vrsqrt.f32 %v460_v5  ;;  %vm625_vm11 = vcmp.gt.f32.partialorder %v460_v5, 1.0  ;;  %v1513_v5 = vld [vmem:[#allocation2 + $0x300] sm:$0xff] }
 0x15a   :  { %v1369_v47 = vpop.eup %1368  ;;  %1132 = vst [vmem:[#allocation5 + $0x2a8] sm:$0xff] %v1004_v32 }
 0x15b   :  { %v1371_v26 = vpop.eup %1370  ;;  %1131 = vst [vmem:[#allocation5 + $0x2a0] sm:$0xff] %v1003_v33  ;;  %v878_v52 = vsel %vm622_vm6, %v1369_v47, 1.0  ;;  %v466_v38 = vpop.xlane.xlu1 %465 }
 0x15c   :  { %v464_v50 = vpop.xlane.xlu0 %463  ;;  %v1006_v27 = vmul.f32 %v1502_v53, %v878_v52  ;;  %v877_v51 = vsel %vm621_vm7, %v1371_v26, 1.0  ;;  %1380 = vrsqrt.f32 %v466_v38  ;;  %vm628_vm12 = vcmp.gt.f32.partialorder %v466_v38, 1.0  ;;  %v1514_v26 = vld [vmem:[#allocation2 + $0x318] sm:$0xff] }
 0x15d   :  { %v1005_v54 = vmul.f32 %v1503_v20, %v877_v51  ;;  %1382 = vrsqrt.f32 %v464_v50  ;;  %vm627_vm13 = vcmp.gt.f32.partialorder %v464_v50, 1.0  ;;  %v1515_v50 = vld [vmem:[#allocation2 + $0x310] sm:$0xff] }
 0x15e   :  { %v1373_v36 = vpop.eup %1372  ;;  %1134 = vst [vmem:[#allocation5 + $0x2b8] sm:$0xff] %v1006_v27 }
 0x15f   :  { %v1375_v58 = vpop.eup %1374  ;;  %1133 = vst [vmem:[#allocation5 + $0x2b0] sm:$0xff] %v1005_v54  ;;  %v880_v21 = vsel %vm624_vm8, %v1373_v36, 1.0  ;;  %v470_v37 = vpop.xlane.xlu1 %469 }
 0x160   :  { %v468_v56 = vpop.xlane.xlu0 %467  ;;  %v1008_v55 = vmul.f32 %v1504_v62, %v880_v21  ;;  %v879_v57 = vsel %vm623_vm9, %v1375_v58, 1.0  ;;  %1384 = vrsqrt.f32 %v470_v37  ;;  %vm630_vm14 = vcmp.gt.f32.partialorder %v470_v37, 1.0  ;;  %v1516_v58 = vld [vmem:[#allocation2 + $0x328] sm:$0xff] }
 0x161   :  { %v1007_v59 = vmul.f32 %v1505_v9, %v879_v57  ;;  %1386 = vrsqrt.f32 %v468_v56  ;;  %vm629_vm15 = vcmp.gt.f32.partialorder %v468_v56, 1.0  ;;  %v1517_v56 = vld [vmem:[#allocation2 + $0x320] sm:$0xff] }
 0x162   :  { %v1377_v8 = vpop.eup %1376  ;;  %1136 = vst [vmem:[#allocation5 + $0x2c8] sm:$0xff] %v1008_v55 }
 0x163   :  { %v1379_v43 = vpop.eup %1378  ;;  %1135 = vst [vmem:[#allocation5 + $0x2c0] sm:$0xff] %v1007_v59  ;;  %v882_v63 = vsel %vm626_vm10, %v1377_v8, 1.0  ;;  %v474_v6 = vpop.xlane.xlu1 %473 }
 0x164   :  { %v472_v40 = vpop.xlane.xlu0 %471  ;;  %v1010_v60 = vmul.f32 %v1506_v24, %v882_v63  ;;  %v881_v46 = vsel %vm625_vm11, %v1379_v43, 1.0  ;;  %1388 = vrsqrt.f32 %v474_v6  ;;  %vm632_vm0 = vcmp.gt.f32.partialorder %v474_v6, 1.0  ;;  %v1518_v43 = vld [vmem:[#allocation2 + $0x338] sm:$0xff] }
 0x165   :  { %v1009_v61 = vmul.f32 %v1507_v41, %v881_v46  ;;  %1390 = vrsqrt.f32 %v472_v40  ;;  %vm631_vm1 = vcmp.gt.f32.partialorder %v472_v40, 1.0  ;;  %v1519_v40 = vld [vmem:[#allocation2 + $0x330] sm:$0xff] }
 0x166   :  { %v1381_v0 = vpop.eup %1380  ;;  %1138 = vst [vmem:[#allocation5 + $0x2d8] sm:$0xff] %v1010_v60 }
 0x167   :  { %v1383_v25 = vpop.eup %1382  ;;  %1137 = vst [vmem:[#allocation5 + $0x2d0] sm:$0xff] %v1009_v61  ;;  %v884_v19 = vsel %vm628_vm12, %v1381_v0, 1.0  ;;  %v478_v1 = vpop.xlane.xlu1 %477 }
 0x168   :  { %v476_v22 = vpop.xlane.xlu0 %475  ;;  %v1012_v12 = vmul.f32 %v1508_v23, %v884_v19  ;;  %v883_v13 = vsel %vm627_vm13, %v1383_v25, 1.0  ;;  %1392 = vrsqrt.f32 %v478_v1  ;;  %vm634_vm2 = vcmp.gt.f32.partialorder %v478_v1, 1.0  ;;  %v1520_v25 = vld [vmem:[#allocation2 + $0x348] sm:$0xff] }
 0x169   :  { %v1011_v44 = vmul.f32 %v1509_v3, %v883_v13  ;;  %1394 = vrsqrt.f32 %v476_v22  ;;  %vm633_vm3 = vcmp.gt.f32.partialorder %v476_v22, 1.0  ;;  %v1521_v22 = vld [vmem:[#allocation2 + $0x340] sm:$0xff] }
 0x16a   :  { %v1385_v4 = vpop.eup %1384  ;;  %1140 = vst [vmem:[#allocation5 + $0x2e8] sm:$0xff] %v1012_v12 }
 0x16b   :  { %v1387_v14 = vpop.eup %1386  ;;  %1139 = vst [vmem:[#allocation5 + $0x2e0] sm:$0xff] %v1011_v44  ;;  %v886_v7 = vsel %vm630_vm14, %v1385_v4, 1.0  ;;  %v482_v45 = vpop.xlane.xlu1 %481 }
 0x16c   :  { %v480_v28 = vpop.xlane.xlu0 %479  ;;  %v1014_v15 = vmul.f32 %v1510_v30, %v886_v7  ;;  %v885_v29 = vsel %vm629_vm15, %v1387_v14, 1.0  ;;  %1396 = vrsqrt.f32 %v482_v45  ;;  %vm636_vm4 = vcmp.gt.f32.partialorder %v482_v45, 1.0  ;;  %v1522_v14 = vld [vmem:[#allocation2 + $0x358] sm:$0xff] }
 0x16d   :  { %v1013_v10 = vmul.f32 %v1511_v18, %v885_v29  ;;  %1398 = vrsqrt.f32 %v480_v28  ;;  %vm635_vm5 = vcmp.gt.f32.partialorder %v480_v28, 1.0  ;;  %v1523_v28 = vld [vmem:[#allocation2 + $0x350] sm:$0xff] }
 0x16e   :  { %v1389_v31 = vpop.eup %1388  ;;  %1142 = vst [vmem:[#allocation5 + $0x2f8] sm:$0xff] %v1014_v15 }
 0x16f   :  { %v1391_v34 = vpop.eup %1390  ;;  %1141 = vst [vmem:[#allocation5 + $0x2f0] sm:$0xff] %v1013_v10  ;;  %v888_v11 = vsel %vm632_vm0, %v1389_v31, 1.0  ;;  %v486_v2 = vpop.xlane.xlu1 %485 }
 0x170   :  { %v484_v48 = vpop.xlane.xlu0 %483  ;;  %v1016_v39 = vmul.f32 %v1512_v16, %v888_v11  ;;  %v887_v49 = vsel %vm631_vm1, %v1391_v34, 1.0  ;;  %1400 = vrsqrt.f32 %v486_v2  ;;  %vm638_vm6 = vcmp.gt.f32.partialorder %v486_v2, 1.0  ;;  %v1524_v34 = vld [vmem:[#allocation2 + $0x368] sm:$0xff] }
 0x171   :  { %v1015_v17 = vmul.f32 %v1513_v5, %v887_v49  ;;  %1402 = vrsqrt.f32 %v484_v48  ;;  %vm637_vm7 = vcmp.gt.f32.partialorder %v484_v48, 1.0  ;;  %v1525_v48 = vld [vmem:[#allocation2 + $0x360] sm:$0xff] }
 0x172   :  { %v1393_v32 = vpop.eup %1392  ;;  %1144 = vst [vmem:[#allocation5 + $0x308] sm:$0xff] %v1016_v39 }
 0x173   :  { %v1395_v42 = vpop.eup %1394  ;;  %1143 = vst [vmem:[#allocation5 + $0x300] sm:$0xff] %v1015_v17  ;;  %v890_v35 = vsel %vm634_vm2, %v1393_v32, 1.0  ;;  %v490_v33 = vpop.xlane.xlu1 %489 }
 0x174   :  { %v488_v47 = vpop.xlane.xlu0 %487  ;;  %v1018_v52 = vmul.f32 %v1514_v26, %v890_v35  ;;  %v889_v38 = vsel %vm633_vm3, %v1395_v42, 1.0  ;;  %1404 = vrsqrt.f32 %v490_v33  ;;  %vm640_vm8 = vcmp.gt.f32.partialorder %v490_v33, 1.0  ;;  %v1526_v42 = vld [vmem:[#allocation2 + $0x378] sm:$0xff] }
 0x175   :  { %v1017_v53 = vmul.f32 %v1515_v50, %v889_v38  ;;  %1406 = vrsqrt.f32 %v488_v47  ;;  %vm639_vm9 = vcmp.gt.f32.partialorder %v488_v47, 1.0  ;;  %v1527_v47 = vld [vmem:[#allocation2 + $0x370] sm:$0xff] }
 0x176   :  { %v1397_v27 = vpop.eup %1396  ;;  %1146 = vst [vmem:[#allocation5 + $0x318] sm:$0xff] %v1018_v52 }
 0x177   :  { %v1399_v51 = vpop.eup %1398  ;;  %1145 = vst [vmem:[#allocation5 + $0x310] sm:$0xff] %v1017_v53  ;;  %v892_v20 = vsel %vm636_vm4, %v1397_v27, 1.0  ;;  %v494_v54 = vpop.xlane.xlu1 %493 }
 0x178   :  { %v492_v36 = vpop.xlane.xlu0 %491  ;;  %v1020_v21 = vmul.f32 %v1516_v58, %v892_v20  ;;  %v891_v37 = vsel %vm635_vm5, %v1399_v51, 1.0  ;;  %1408 = vrsqrt.f32 %v494_v54  ;;  %vm642_vm10 = vcmp.gt.f32.partialorder %v494_v54, 1.0  ;;  %v1528_v51 = vld [vmem:[#allocation2 + $0x388] sm:$0xff] }
 0x179   :  { %v1019_v62 = vmul.f32 %v1517_v56, %v891_v37  ;;  %1410 = vrsqrt.f32 %v492_v36  ;;  %vm641_vm11 = vcmp.gt.f32.partialorder %v492_v36, 1.0  ;;  %v1529_v36 = vld [vmem:[#allocation2 + $0x380] sm:$0xff] }
 0x17a   :  { %v1401_v55 = vpop.eup %1400  ;;  %1148 = vst [vmem:[#allocation5 + $0x328] sm:$0xff] %v1020_v21 }
 0x17b   :  { %v1403_v57 = vpop.eup %1402  ;;  %1147 = vst [vmem:[#allocation5 + $0x320] sm:$0xff] %v1019_v62  ;;  %v894_v9 = vsel %vm638_vm6, %v1401_v55, 1.0  ;;  %v498_v59 = vpop.xlane.xlu1 %497 }
 0x17c   :  { %v496_v8 = vpop.xlane.xlu0 %495  ;;  %v1022_v63 = vmul.f32 %v1518_v43, %v894_v9  ;;  %v893_v6 = vsel %vm637_vm7, %v1403_v57, 1.0  ;;  %1412 = vrsqrt.f32 %v498_v59  ;;  %vm644_vm12 = vcmp.gt.f32.partialorder %v498_v59, 1.0  ;;  %v1530_v57 = vld [vmem:[#allocation2 + $0x398] sm:$0xff] }
 0x17d   :  { %v1021_v24 = vmul.f32 %v1519_v40, %v893_v6  ;;  %1414 = vrsqrt.f32 %v496_v8  ;;  %vm643_vm13 = vcmp.gt.f32.partialorder %v496_v8, 1.0  ;;  %v1531_v8 = vld [vmem:[#allocation2 + $0x390] sm:$0xff] }
 0x17e   :  { %v1405_v60 = vpop.eup %1404  ;;  %1150 = vst [vmem:[#allocation5 + $0x338] sm:$0xff] %v1022_v63 }
 0x17f   :  { %v1407_v46 = vpop.eup %1406  ;;  %1149 = vst [vmem:[#allocation5 + $0x330] sm:$0xff] %v1021_v24  ;;  %v896_v41 = vsel %vm640_vm8, %v1405_v60, 1.0  ;;  %v502_v61 = vpop.xlane.xlu1 %501 }
 0x180   :  { %v500_v0 = vpop.xlane.xlu0 %499  ;;  %v1024_v19 = vmul.f32 %v1520_v25, %v896_v41  ;;  %v895_v1 = vsel %vm639_vm9, %v1407_v46, 1.0  ;;  %1416 = vrsqrt.f32 %v502_v61  ;;  %vm646_vm14 = vcmp.gt.f32.partialorder %v502_v61, 1.0  ;;  %v1532_v46 = vld [vmem:[#allocation2 + $0x3a8] sm:$0xff] }
 0x181   :  { %v1023_v23 = vmul.f32 %v1521_v22, %v895_v1  ;;  %1418 = vrsqrt.f32 %v500_v0  ;;  %vm645_vm15 = vcmp.gt.f32.partialorder %v500_v0, 1.0  ;;  %v1533_v0 = vld [vmem:[#allocation2 + $0x3a0] sm:$0xff] }
 0x182   :  { %v1409_v12 = vpop.eup %1408  ;;  %1152 = vst [vmem:[#allocation5 + $0x348] sm:$0xff] %v1024_v19 }
 0x183   :  { %v1411_v13 = vpop.eup %1410  ;;  %1151 = vst [vmem:[#allocation5 + $0x340] sm:$0xff] %v1023_v23  ;;  %v898_v3 = vsel %vm642_vm10, %v1409_v12, 1.0  ;;  %v506_v44 = vpop.xlane.xlu1 %505 }
 0x184   :  { %v504_v4 = vpop.xlane.xlu0 %503  ;;  %v1026_v7 = vmul.f32 %v1522_v14, %v898_v3  ;;  %v897_v45 = vsel %vm641_vm11, %v1411_v13, 1.0  ;;  %1420 = vrsqrt.f32 %v506_v44  ;;  %vm648_vm0 = vcmp.gt.f32.partialorder %v506_v44, 1.0  ;;  %v1534_v13 = vld [vmem:[#allocation2 + $0x3b8] sm:$0xff] }
 0x185   :  { %v1025_v30 = vmul.f32 %v1523_v28, %v897_v45  ;;  %1422 = vrsqrt.f32 %v504_v4  ;;  %vm647_vm1 = vcmp.gt.f32.partialorder %v504_v4, 1.0  ;;  %v1535_v4 = vld [vmem:[#allocation2 + $0x3b0] sm:$0xff] }
 0x186   :  { %v1413_v15 = vpop.eup %1412  ;;  %1154 = vst [vmem:[#allocation5 + $0x358] sm:$0xff] %v1026_v7 }
 0x187   :  { %v1415_v29 = vpop.eup %1414  ;;  %1153 = vst [vmem:[#allocation5 + $0x350] sm:$0xff] %v1025_v30  ;;  %v900_v18 = vsel %vm644_vm12, %v1413_v15, 1.0  ;;  %v510_v10 = vpop.xlane.xlu1 %509 }
 0x188   :  { %v508_v31 = vpop.xlane.xlu0 %507  ;;  %v1028_v11 = vmul.f32 %v1524_v34, %v900_v18  ;;  %v899_v2 = vsel %vm643_vm13, %v1415_v29, 1.0  ;;  %1424 = vrsqrt.f32 %v510_v10  ;;  %vm650_vm2 = vcmp.gt.f32.partialorder %v510_v10, 1.0  ;;  %v1536_v29 = vld [vmem:[#allocation2 + $0x3c8] sm:$0xff] }
 0x189   :  { %v1027_v16 = vmul.f32 %v1525_v48, %v899_v2  ;;  %1426 = vrsqrt.f32 %v508_v31  ;;  %vm649_vm3 = vcmp.gt.f32.partialorder %v508_v31, 1.0  ;;  %v1537_v31 = vld [vmem:[#allocation2 + $0x3c0] sm:$0xff] }
 0x18a   :  { %v1417_v39 = vpop.eup %1416  ;;  %1156 = vst [vmem:[#allocation5 + $0x368] sm:$0xff] %v1028_v11 }
 0x18b   :  { %v1419_v49 = vpop.eup %1418  ;;  %1155 = vst [vmem:[#allocation5 + $0x360] sm:$0xff] %v1027_v16  ;;  %v902_v5 = vsel %vm646_vm14, %v1417_v39, 1.0  ;;  %v514_v17 = vpop.xlane.xlu1 %513  ;;  %v1538_v16 = vld [vmem:[#allocation2 + $0x3d8] sm:$0xff] }
 0x18c   :  { %v512_v32 = vpop.xlane.xlu0 %511  ;;  %v1030_v35 = vmul.f32 %v1526_v42, %v902_v5  ;;  %v901_v33 = vsel %vm645_vm15, %v1419_v49, 1.0  ;;  %1428 = vrsqrt.f32 %v514_v17  ;;  %vm652_vm4 = vcmp.gt.f32.partialorder %v514_v17, 1.0  ;;  %v1539_v5 = vld [vmem:[#allocation2 + $0x3d0] sm:$0xff] }
 0x18d   :  { %v1029_v26 = vmul.f32 %v1527_v47, %v901_v33  ;;  %1430 = vrsqrt.f32 %v512_v32  ;;  %vm651_vm5 = vcmp.gt.f32.partialorder %v512_v32, 1.0  ;;  %v1540_v33 = vld [vmem:[#allocation2 + $0x3e8] sm:$0xff] }
 0x18e   :  { %v1421_v52 = vpop.eup %1420  ;;  %1158 = vst [vmem:[#allocation5 + $0x378] sm:$0xff] %v1030_v35 }
 0x18f   :  { %v1423_v38 = vpop.eup %1422  ;;  %1157 = vst [vmem:[#allocation5 + $0x370] sm:$0xff] %v1029_v26  ;;  %v904_v50 = vsel %vm648_vm0, %v1421_v52, 1.0  ;;  %v518_v53 = vpop.xlane.xlu1 %517  ;;  %v1541_v52 = vld [vmem:[#allocation2 + $0x3e0] sm:$0xff] }
 0x190   :  { %v516_v27 = vpop.xlane.xlu0 %515  ;;  %v1032_v20 = vmul.f32 %v1528_v51, %v904_v50  ;;  %v903_v54 = vsel %vm647_vm1, %v1423_v38, 1.0  ;;  %1432 = vrsqrt.f32 %v518_v53  ;;  %vm654_vm6 = vcmp.gt.f32.partialorder %v518_v53, 1.0  ;;  %v1542_v51 = vld [vmem:[#allocation2 + $0x3f8] sm:$0xff] }
 0x191   :  { %v1031_v58 = vmul.f32 %v1529_v36, %v903_v54  ;;  %1434 = vrsqrt.f32 %v516_v27  ;;  %vm653_vm7 = vcmp.gt.f32.partialorder %v516_v27, 1.0  ;;  %v1543_v36 = vld [vmem:[#allocation2 + $0x3f0] sm:$0xff] }
 0x192   :  { %v1425_v21 = vpop.eup %1424  ;;  %1160 = vst [vmem:[#allocation5 + $0x388] sm:$0xff] %v1032_v20 }
 0x193   :  { %v1427_v37 = vpop.eup %1426  ;;  %1159 = vst [vmem:[#allocation5 + $0x380] sm:$0xff] %v1031_v58  ;;  %v906_v56 = vsel %vm650_vm2, %v1425_v21, 1.0  ;;  %v522_v62 = vpop.xlane.xlu1 %521 }
 0x194   :  { %v520_v55 = vpop.xlane.xlu0 %519  ;;  %v1034_v9 = vmul.f32 %v1530_v57, %v906_v56  ;;  %v905_v59 = vsel %vm649_vm3, %v1427_v37, 1.0  ;;  %1436 = vrsqrt.f32 %v522_v62  ;;  %vm656_vm8 = vcmp.gt.f32.partialorder %v522_v62, 1.0 }
 0x195   :  { %v1033_v43 = vmul.f32 %v1531_v8, %v905_v59  ;;  %1438 = vrsqrt.f32 %v520_v55  ;;  %vm655_vm9 = vcmp.gt.f32.partialorder %v520_v55, 1.0 }
 0x196   :  { %v1429_v63 = vpop.eup %1428  ;;  %1162 = vst [vmem:[#allocation5 + $0x398] sm:$0xff] %v1034_v9 }
 0x197   :  { %v1431_v6 = vpop.eup %1430  ;;  %1161 = vst [vmem:[#allocation5 + $0x390] sm:$0xff] %v1033_v43  ;;  %v908_v40 = vsel %vm652_vm4, %v1429_v63, 1.0  ;;  %v526_v24 = vpop.xlane.xlu1 %525 }
 0x198   :  { %v524_v60 = vpop.xlane.xlu0 %523  ;;  %v1036_v41 = vmul.f32 %v1532_v46, %v908_v40  ;;  %v907_v61 = vsel %vm651_vm5, %v1431_v6, 1.0  ;;  %1440 = vrsqrt.f32 %v526_v24  ;;  %vm658_vm10 = vcmp.gt.f32.partialorder %v526_v24, 1.0 }
 0x199   :  { %v1035_v25 = vmul.f32 %v1533_v0, %v907_v61  ;;  %1442 = vrsqrt.f32 %v524_v60  ;;  %vm657_vm11 = vcmp.gt.f32.partialorder %v524_v60, 1.0 }
 0x19a   :  { %v1433_v19 = vpop.eup %1432  ;;  %1164 = vst [vmem:[#allocation5 + $0x3a8] sm:$0xff] %v1036_v41 }
 0x19b   :  { %v1435_v1 = vpop.eup %1434  ;;  %1163 = vst [vmem:[#allocation5 + $0x3a0] sm:$0xff] %v1035_v25  ;;  %v910_v22 = vsel %vm654_vm6, %v1433_v19, 1.0  ;;  %v530_v23 = vpop.xlane.xlu1 %529 }
 0x19c   :  { %v528_v12 = vpop.xlane.xlu0 %527  ;;  %v1038_v3 = vmul.f32 %v1534_v13, %v910_v22  ;;  %v909_v44 = vsel %vm653_vm7, %v1435_v1, 1.0  ;;  %1444 = vrsqrt.f32 %v530_v23  ;;  %vm660_vm12 = vcmp.gt.f32.partialorder %v530_v23, 1.0 }
 0x19d   :  { %v1037_v14 = vmul.f32 %v1535_v4, %v909_v44  ;;  %1446 = vrsqrt.f32 %v528_v12  ;;  %vm659_vm13 = vcmp.gt.f32.partialorder %v528_v12, 1.0 }
 0x19e   :  { %v1437_v7 = vpop.eup %1436  ;;  %1166 = vst [vmem:[#allocation5 + $0x3b8] sm:$0xff] %v1038_v3 }
 0x19f   :  { %v1439_v45 = vpop.eup %1438  ;;  %1165 = vst [vmem:[#allocation5 + $0x3b0] sm:$0xff] %v1037_v14  ;;  %v912_v28 = vsel %vm656_vm8, %v1437_v7, 1.0  ;;  %v534_v30 = vpop.xlane.xlu1 %533 }
 0x1a0   :  { %v532_v15 = vpop.xlane.xlu0 %531  ;;  %v1040_v18 = vmul.f32 %v1536_v29, %v912_v28  ;;  %v911_v10 = vsel %vm655_vm9, %v1439_v45, 1.0  ;;  %1448 = vrsqrt.f32 %v534_v30  ;;  %vm662_vm14 = vcmp.gt.f32.partialorder %v534_v30, 1.0 }
 0x1a1   :  { %v1039_v34 = vmul.f32 %v1537_v31, %v911_v10  ;;  %1450 = vrsqrt.f32 %v532_v15  ;;  %vm661_vm15 = vcmp.gt.f32.partialorder %v532_v15, 1.0 }
 0x1a2   :  { %v1441_v11 = vpop.eup %1440  ;;  %1168 = vst [vmem:[#allocation5 + $0x3c8] sm:$0xff] %v1040_v18 }
 0x1a3   :  { %v1443_v2 = vpop.eup %1442  ;;  %1167 = vst [vmem:[#allocation5 + $0x3c0] sm:$0xff] %v1039_v34  ;;  %v914_v48 = vsel %vm658_vm10, %v1441_v11, 1.0 }
 0x1a4   :  { %v1042_v39 = vmul.f32 %v1538_v16, %v914_v48  ;;  %v913_v49 = vsel %vm657_vm11, %v1443_v2, 1.0 }
 0x1a5   :  { %v1041_v17 = vmul.f32 %v1539_v5, %v913_v49 }
 0x1a6   :  { %v1445_v32 = vpop.eup %1444  ;;  %1170 = vst [vmem:[#allocation5 + $0x3d8] sm:$0xff] %v1042_v39 }
 0x1a7   :  { %v1447_v42 = vpop.eup %1446  ;;  %1169 = vst [vmem:[#allocation5 + $0x3d0] sm:$0xff] %v1041_v17  ;;  %v916_v35 = vsel %vm660_vm12, %v1445_v32, 1.0 }
 0x1a8   :  { %v1044_v47 = vmul.f32 %v1540_v33, %v916_v35  ;;  %v915_v26 = vsel %vm659_vm13, %v1447_v42, 1.0 }
 0x1a9   :  { %v1043_v38 = vmul.f32 %v1541_v52, %v915_v26 }
 0x1aa   :  { %v1449_v50 = vpop.eup %1448  ;;  %1172 = vst [vmem:[#allocation5 + $0x3e8] sm:$0xff] %v1044_v47 }
 0x1ab   :  { %v1451_v53 = vpop.eup %1450  ;;  %1171 = vst [vmem:[#allocation5 + $0x3e0] sm:$0xff] %v1043_v38  ;;  %v918_v27 = vsel %vm662_vm14, %v1449_v50, 1.0 }
 0x1ac   :  { %v1046_v20 = vmul.f32 %v1542_v51, %v918_v27  ;;  %v917_v54 = vsel %vm661_vm15, %v1451_v53, 1.0 }
 0x1ad   :  { %v1045_v58 = vmul.f32 %v1543_v36, %v917_v54 }
 0x1ae   :  { %1174 = vst [vmem:[#allocation5 + $0x3f8] sm:$0xff] %v1046_v20 }
 0x1af   :  { %1173 = vst [vmem:[#allocation5 + $0x3f0] sm:$0xff] %v1045_v58 }
 0x1b0   :  { %1577 = shalt.err (!%p1574_p12)
}
 0x1b1   :  { %s1578_s24 = scalar_lea.hbm %s1929_s1, 16384 }
 0x1b2   :  { %p1579_p13 = scmp.ne.s32.totalorder %s1929_s1, %s1578_s24  ;;  %p1582_p0 = scmp.lt.u32.totalorder %s1578_s24, %s1929_s1 }
 0x1b4   :  { %p1584_p1 = pnand %p1582_p0, %p1579_p13 }
 0x1b6   :  { %1587 = shalt.err (!%p1584_p1)
}
 0x1b7   :  { %1186 = dma.vmem_to_hbm [thread:$0]  %s1181_s20, 16384, %s1929_s1, [#allocation4], %s1593_s16, %s1593_s16, %s1594_s17  }
 0x1b8   :  { %1590 = dma.done.wait [#allocation4], 16384  }
 0x1b9   :  { %1591 = vsyncadd [#allocation4], 4294950912 }
 0x1ba   :  { %1190 = vsyncpa [#allocation3], 1 }
 0x1bb   :  { %1191 = vsyncpa [#allocation4], 1 }

</bundles_post_ra>
